<compile_context>
chip_gen: v7x
topology: tpu7x:2x2x1
jax: 0.10.0
libtpu: 0.0.40
codegen_flags: <defaults>
</compile_context>

<pallas_src>
import functools

import jax
import jax.numpy as jnp
from jax.experimental import pallas as pl
from jax.experimental.pallas import tpu as pltpu


def _sigmoid_via_tanh(z):
    # sigmoid(z) == 0.5 * tanh(0.5 * z) + 0.5  (one EUP transcendental
    # instead of exp + reciprocal).
    return 0.5 * jnp.tanh(0.5 * z) + 0.5


def _lstm_cell_kernel(x_ref, h_ref, c1_ref, wx_ref, wh_ref, b_ref,
                      h_out_ref, c_out_ref, *, hidden_dim):
    # Two fused MXU matmuls for all four gates; f32 accumulation, f32 bias.
    gates = (
        jnp.dot(x_ref[...], wx_ref[...], preferred_element_type=jnp.float32)
        + jnp.dot(h_ref[...], wh_ref[...], preferred_element_type=jnp.float32)
        + b_ref[...]
    )

    H = hidden_dim
    i_g = _sigmoid_via_tanh(gates[:, 0 * H:1 * H])
    f_g = _sigmoid_via_tanh(gates[:, 1 * H:2 * H])
    o_g = _sigmoid_via_tanh(gates[:, 2 * H:3 * H])
    c_g = jnp.tanh(gates[:, 3 * H:4 * H])

    # Module semantics: c = sigmoid(f * c_1 + i * c_);  h = tanh(c) * o
    c_new = _sigmoid_via_tanh(f_g * c1_ref[...] + i_g * c_g)
    h_new = jnp.tanh(c_new) * o_g

    h_out_ref[...] = h_new.astype(h_out_ref.dtype)
    c_out_ref[...] = c_new.astype(c_out_ref.dtype)


def pack_lstm_params(wx, bx, wh, bh, matmul_dtype=jnp.bfloat16):
    """One-time parameter packing (hoisted out of the per-step call path).

    wx, wh: (4, input_dim, hidden_dim) per-gate weights in gate order
            (i, f, o, c_), already in the "v @ W" convention.
    bx, bh: (4, 1, hidden_dim) per-gate biases.

    Returns (Wx, Wh, b): Wx/Wh (input_dim, 4*hidden_dim) in matmul_dtype with
    gate-major columns [i|f|o|c_]; b (1, 4*hidden_dim) float32 with bx+bh
    pre-folded.
    """
    _, input_dim, hidden_dim = wx.shape
    w_x = wx.transpose(1, 0, 2).reshape(input_dim, 4 * hidden_dim)
    w_h = wh.transpose(1, 0, 2).reshape(input_dim, 4 * hidden_dim)
    b = (bx + bh).astype(jnp.float32).transpose(1, 0, 2).reshape(1, 4 * hidden_dim)
    return w_x.astype(matmul_dtype), w_h.astype(matmul_dtype), b


def _choose_batch_tile(batch, max_rows=512):
    """Largest sublane-aligned tile dividing `batch`, capped for VMEM,
    preferring >= 2 grid steps so the v7x megacore gets work on both cores."""
    if batch % 8 != 0:
        return batch                       # full-extent block (always legal)
    best = 8
    for tb in range(8, min(batch, max_rows) + 1, 8):
        if batch % tb == 0:
            best = tb
    if best == batch and batch >= 16 and (batch // 2) % 8 == 0:
        best = batch // 2                  # 2 parallel tiles for v7x's 2 TCs
    return best


def lstm_cell(x, h, c_1, w_x, w_h, b):
    """x, h: (B, input_dim); c_1: (B, hidden_dim); (w_x, w_h, b) from
    pack_lstm_params.  Returns (h_new, c_new), each (B, hidden_dim)."""
    B, input_dim = x.shape
    hidden_dim = c_1.shape[1]
    assert w_x.shape == (input_dim, 4 * hidden_dim)
    assert w_h.shape == (input_dim, 4 * hidden_dim)
    assert b.shape == (1, 4 * hidden_dim)

    mm_dtype = w_x.dtype
    x_mm = x.astype(mm_dtype)
    h_mm = h.astype(mm_dtype)
    c1_f32 = c_1.astype(jnp.float32)

    tb = _choose_batch_tile(B)
    grid = (B // tb,)

    kernel = functools.partial(_lstm_cell_kernel, hidden_dim=hidden_dim)

    itemsize_mm = jnp.dtype(mm_dtype).itemsize
    out_itemsize = jnp.dtype(x.dtype).itemsize
    cost = pl.CostEstimate(
        flops=2 * B * (2 * input_dim) * (4 * hidden_dim),
        transcendentals=6 * B * hidden_dim,
        bytes_accessed=(2 * B * input_dim * itemsize_mm                 # x, h
                        + B * hidden_dim * 4                            # c_1
                        + 2 * input_dim * 4 * hidden_dim * itemsize_mm  # Wx, Wh
                        + 4 * hidden_dim * 4                            # b
                        + 2 * B * hidden_dim * out_itemsize),           # outputs
    )

    # Rough VMEM footprint (double-buffered pipelined blocks) to pick a safe
    # scoped-VMEM limit; never lower it below the 32 MiB default.
    vmem_est = (2 * (2 * tb * input_dim * itemsize_mm)                  # x, h tiles
                + 2 * (tb * hidden_dim * 4)                             # c_1 tile
                + 2 * (2 * input_dim * 4 * hidden_dim * itemsize_mm)    # Wx, Wh
                + 2 * (4 * hidden_dim * 4)                              # b
                + 2 * (2 * tb * hidden_dim * out_itemsize))             # outputs
    vmem_limit = min(max(32 * 1024 * 1024, (vmem_est * 3) // 2),
                     100 * 1024 * 1024)

    h_new, c_new = pl.pallas_call(
        kernel,
        out_shape=(jax.ShapeDtypeStruct((B, hidden_dim), x.dtype),
                   jax.ShapeDtypeStruct((B, hidden_dim), x.dtype)),
        grid_spec=pltpu.PrefetchScalarGridSpec(
            num_scalar_prefetch=0,
            grid=grid,
            in_specs=[
                pl.BlockSpec((tb, input_dim), lambda i: (i, 0)),             # x tile
                pl.BlockSpec((tb, input_dim), lambda i: (i, 0)),             # h tile
                pl.BlockSpec((tb, hidden_dim), lambda i: (i, 0)),            # c_1 tile
                pl.BlockSpec((input_dim, 4 * hidden_dim), lambda i: (0, 0)),  # Wx (resident)
                pl.BlockSpec((input_dim, 4 * hidden_dim), lambda i: (0, 0)),  # Wh (resident)
                pl.BlockSpec((1, 4 * hidden_dim), lambda i: (0, 0)),          # b  (resident)
            ],
            out_specs=(pl.BlockSpec((tb, hidden_dim), lambda i: (i, 0)),     # h_new
                       pl.BlockSpec((tb, hidden_dim), lambda i: (i, 0))),    # c_new
        ),
        compiler_params=pltpu.CompilerParams(
            dimension_semantics=("parallel",),
            vmem_limit_bytes=vmem_limit),
        cost_estimate=cost,
    )(x_mm, h_mm, c1_f32, w_x, w_h, b)

    return h_new, c_new


def reference_lstm_cell(x, h, c_1, wx, bx, wh, bh):
    def lin(v, w_, b_):
        return v @ w_ + b_[0]
    i = jax.nn.sigmoid(lin(x, wx[0], bx[0]) + lin(h, wh[0], bh[0]))
    f = jax.nn.sigmoid(lin(x, wx[1], bx[1]) + lin(h, wh[1], bh[1]))
    o = jax.nn.sigmoid(lin(x, wx[2], bx[2]) + lin(h, wh[2], bh[2]))
    c_ = jnp.tanh(lin(x, wx[3], bx[3]) + lin(h, wh[3], bh[3]))
    c = jax.nn.sigmoid(f * c_1 + i * c_)
    h_new = jnp.tanh(c) * o
    return h_new, c


if __name__ == "__main__":
    # Lane-aligned small demo shapes: hidden_dim = 128 keeps every gate slice
    # and both outputs lane-dense; batch of 256 gives two parallel 128-row
    # tiles (keeps both v7x TensorCores busy, negligible step overhead on
    # v5e/v6e).
    B, input_dim, hidden_dim = 256, 128, 128
    key = jax.random.PRNGKey(0)
    k = jax.random.split(key, 8)

    x = jax.random.normal(k[0], (B, input_dim), dtype=jnp.float32)
    h = jax.random.normal(k[1], (B, input_dim), dtype=jnp.float32)
    c_1 = jax.random.normal(k[2], (B, hidden_dim), dtype=jnp.float32)

    # nn.Linear-style init U(-1/sqrt(in), 1/sqrt(in)); gate order (i, f, o, c_).
    bound = float(input_dim) ** -0.5
    wx = jax.random.uniform(k[3], (4, input_dim, hidden_dim),
                            minval=-bound, maxval=bound, dtype=jnp.float32)
    bx = jax.random.uniform(k[4], (4, 1, hidden_dim),
                            minval=-bound, maxval=bound, dtype=jnp.float32)
    wh = jax.random.uniform(k[5], (4, input_dim, hidden_dim),
                            minval=-bound, maxval=bound, dtype=jnp.float32)
    bh = jax.random.uniform(k[6], (4, 1, hidden_dim),
                            minval=-bound, maxval=bound, dtype=jnp.float32)

    # One-time parameter packing (bf16 matmul operands, f32 folded bias).
    w_x, w_h, b = pack_lstm_params(wx, bx, wh, bh, matmul_dtype=jnp.bfloat16)

    h_out, c_out = lstm_cell(x, h, c_1, w_x, w_h, b)
    jax.block_until_ready((h_out, c_out))

    # f32 reference; tolerance relaxed because matmul operands are bf16.
    h_ref, c_ref = reference_lstm_cell(x, h, c_1, wx, bx, wh, bh)
    assert jnp.allclose(h_out, h_ref, atol=2e-2, rtol=2e-2), (
        "h mismatch, max abs err = %f" % float(jnp.max(jnp.abs(h_out - h_ref))))
    assert jnp.allclose(c_out, c_ref, atol=2e-2, rtol=2e-2), (
        "c mismatch, max abs err = %f" % float(jnp.max(jnp.abs(c_out - c_ref))))

    print("KERNEL_OK")
</pallas_src>

<mosaic_0001>
module attributes {stable_mosaic.version = 11 : i64} {
  func.func @_lstm_cell_kernel(%arg0: i32, %arg1: memref<128x128xbf16, #tpu.memory_space<vmem>>, %arg2: memref<128x128xbf16, #tpu.memory_space<vmem>>, %arg3: memref<128x128xf32, #tpu.memory_space<vmem>>, %arg4: memref<128x512xbf16, #tpu.memory_space<vmem>>, %arg5: memref<128x512xbf16, #tpu.memory_space<vmem>>, %arg6: memref<1x512xf32, #tpu.memory_space<vmem>>, %arg7: memref<128x128xf32, #tpu.memory_space<vmem>>, %arg8: memref<128x128xf32, #tpu.memory_space<vmem>>) attributes {dimension_semantics = [#tpu.dimension_semantics<parallel>], iteration_bounds = array<i64: 2>, scalar_prefetch = 0 : i64, scratch_operands = 0 : i64, tpu.core_type = #tpu.core_type<tc>, window_params = [{transform_indices = @transform_0, window_bounds = array<i64: 128, 128>}, {transform_indices = @transform_1, window_bounds = array<i64: 128, 128>}, {transform_indices = @transform_2, window_bounds = array<i64: 128, 128>}, {pipeline_mode = #tpu.pipeline_mode<synchronous>, transform_indices = @transform_3, window_bounds = array<i64: 128, 512>}, {pipeline_mode = #tpu.pipeline_mode<synchronous>, transform_indices = @transform_4, window_bounds = array<i64: 128, 512>}, {pipeline_mode = #tpu.pipeline_mode<synchronous>, transform_indices = @transform_5, window_bounds = array<i64: 1, 512>}, {transform_indices = @transform_6, window_bounds = array<i64: 128, 128>}, {transform_indices = @transform_7, window_bounds = array<i64: 128, 128>}]} {
    %c0 = arith.constant 0 : index
    %c0_0 = arith.constant 0 : index
    %0 = vector.load %arg1[%c0, %c0_0] : memref<128x128xbf16, #tpu.memory_space<vmem>>, vector<128x128xbf16>
    %c0_1 = arith.constant 0 : index
    %c0_2 = arith.constant 0 : index
    %1 = vector.load %arg4[%c0_1, %c0_2] : memref<128x512xbf16, #tpu.memory_space<vmem>>, vector<128x512xbf16>
    %cst = arith.constant dense<0.000000e+00> : vector<128x512xf32>
    %2 = tpu.matmul %0, %1, %cst {dimension_numbers = #tpu.dot_dimension_numbers<[1], [0], [0], [1], [0, 0, 1, 1], [], []>} : vector<128x128xbf16>, vector<128x512xbf16>, vector<128x512xf32> -> vector<128x512xf32>
    %c0_3 = arith.constant 0 : index
    %c0_4 = arith.constant 0 : index
    %3 = vector.load %arg2[%c0_3, %c0_4] : memref<128x128xbf16, #tpu.memory_space<vmem>>, vector<128x128xbf16>
    %c0_5 = arith.constant 0 : index
    %c0_6 = arith.constant 0 : index
    %4 = vector.load %arg5[%c0_5, %c0_6] : memref<128x512xbf16, #tpu.memory_space<vmem>>, vector<128x512xbf16>
    %cst_7 = arith.constant dense<0.000000e+00> : vector<128x512xf32>
    %5 = tpu.matmul %3, %4, %cst_7 {dimension_numbers = #tpu.dot_dimension_numbers<[1], [0], [0], [1], [0, 0, 1, 1], [], []>} : vector<128x128xbf16>, vector<128x512xbf16>, vector<128x512xf32> -> vector<128x512xf32>
    %6 = arith.addf %2, %5 : vector<128x512xf32>
    %c0_8 = arith.constant 0 : index
    %c0_9 = arith.constant 0 : index
    %7 = vector.load %arg6[%c0_8, %c0_9] : memref<1x512xf32, #tpu.memory_space<vmem>>, vector<1x512xf32>
    %8 = vector.broadcast %7 : vector<1x512xf32> to vector<128x512xf32>
    %9 = arith.addf %6, %8 : vector<128x512xf32>
    %10 = vector.extract_strided_slice %9 {offsets = [0, 0], sizes = [128, 128], strides = [1, 1]} : vector<128x512xf32> to vector<128x128xf32>
    %cst_10 = arith.constant 5.000000e-01 : f32
    %11 = vector.broadcast %cst_10 : f32 to vector<128x128xf32>
    %12 = arith.mulf %11, %10 : vector<128x128xf32>
    %13 = math.tanh %12 : vector<128x128xf32>
    %cst_11 = arith.constant 5.000000e-01 : f32
    %14 = vector.broadcast %cst_11 : f32 to vector<128x128xf32>
    %15 = arith.mulf %14, %13 : vector<128x128xf32>
    %cst_12 = arith.constant 5.000000e-01 : f32
    %16 = vector.broadcast %cst_12 : f32 to vector<128x128xf32>
    %17 = arith.addf %15, %16 : vector<128x128xf32>
    %18 = vector.extract_strided_slice %9 {offsets = [0, 128], sizes = [128, 128], strides = [1, 1]} : vector<128x512xf32> to vector<128x128xf32>
    %cst_13 = arith.constant 5.000000e-01 : f32
    %19 = vector.broadcast %cst_13 : f32 to vector<128x128xf32>
    %20 = arith.mulf %19, %18 : vector<128x128xf32>
    %21 = math.tanh %20 : vector<128x128xf32>
    %cst_14 = arith.constant 5.000000e-01 : f32
    %22 = vector.broadcast %cst_14 : f32 to vector<128x128xf32>
    %23 = arith.mulf %22, %21 : vector<128x128xf32>
    %cst_15 = arith.constant 5.000000e-01 : f32
    %24 = vector.broadcast %cst_15 : f32 to vector<128x128xf32>
    %25 = arith.addf %23, %24 : vector<128x128xf32>
    %26 = vector.extract_strided_slice %9 {offsets = [0, 256], sizes = [128, 128], strides = [1, 1]} : vector<128x512xf32> to vector<128x128xf32>
    %cst_16 = arith.constant 5.000000e-01 : f32
    %27 = vector.broadcast %cst_16 : f32 to vector<128x128xf32>
    %28 = arith.mulf %27, %26 : vector<128x128xf32>
    %29 = math.tanh %28 : vector<128x128xf32>
    %cst_17 = arith.constant 5.000000e-01 : f32
    %30 = vector.broadcast %cst_17 : f32 to vector<128x128xf32>
    %31 = arith.mulf %30, %29 : vector<128x128xf32>
    %cst_18 = arith.constant 5.000000e-01 : f32
    %32 = vector.broadcast %cst_18 : f32 to vector<128x128xf32>
    %33 = arith.addf %31, %32 : vector<128x128xf32>
    %34 = vector.extract_strided_slice %9 {offsets = [0, 384], sizes = [128, 128], strides = [1, 1]} : vector<128x512xf32> to vector<128x128xf32>
    %35 = math.tanh %34 : vector<128x128xf32>
    %c0_19 = arith.constant 0 : index
    %c0_20 = arith.constant 0 : index
    %36 = vector.load %arg3[%c0_19, %c0_20] : memref<128x128xf32, #tpu.memory_space<vmem>>, vector<128x128xf32>
    %37 = arith.mulf %25, %36 : vector<128x128xf32>
    %38 = arith.mulf %17, %35 : vector<128x128xf32>
    %39 = arith.addf %37, %38 : vector<128x128xf32>
    %cst_21 = arith.constant 5.000000e-01 : f32
    %40 = vector.broadcast %cst_21 : f32 to vector<128x128xf32>
    %41 = arith.mulf %40, %39 : vector<128x128xf32>
    %42 = math.tanh %41 : vector<128x128xf32>
    %cst_22 = arith.constant 5.000000e-01 : f32
    %43 = vector.broadcast %cst_22 : f32 to vector<128x128xf32>
    %44 = arith.mulf %43, %42 : vector<128x128xf32>
    %cst_23 = arith.constant 5.000000e-01 : f32
    %45 = vector.broadcast %cst_23 : f32 to vector<128x128xf32>
    %46 = arith.addf %44, %45 : vector<128x128xf32>
    %47 = math.tanh %46 : vector<128x128xf32>
    %48 = arith.mulf %47, %33 : vector<128x128xf32>
    %c0_24 = arith.constant 0 : index
    %c0_25 = arith.constant 0 : index
    %49 = vector.load %arg7[%c0_24, %c0_25] : memref<128x128xf32, #tpu.memory_space<vmem>>, vector<128x128xf32>
    tpu.vector_store %arg7[%c0_24, %c0_25], %48 {strides = array<i32>} : memref<128x128xf32, #tpu.memory_space<vmem>>, vector<128x128xf32>,
    %c0_26 = arith.constant 0 : index
    %c0_27 = arith.constant 0 : index
    %50 = vector.load %arg8[%c0_26, %c0_27] : memref<128x128xf32, #tpu.memory_space<vmem>>, vector<128x128xf32>
    tpu.vector_store %arg8[%c0_26, %c0_27], %46 {strides = array<i32>} : memref<128x128xf32, #tpu.memory_space<vmem>>, vector<128x128xf32>,
    return
  }
  func.func @transform_0(%arg0: i32) -> (i32, i32) {
    %c0_i32 = arith.constant 0 : i32
    %c0_i32_0 = arith.constant 0 : i32
    return %arg0, %c0_i32 : i32, i32
  }
  func.func @transform_1(%arg0: i32) -> (i32, i32) {
    %c0_i32 = arith.constant 0 : i32
    %c0_i32_0 = arith.constant 0 : i32
    return %arg0, %c0_i32 : i32, i32
  }
  func.func @transform_2(%arg0: i32) -> (i32, i32) {
    %c0_i32 = arith.constant 0 : i32
    %c0_i32_0 = arith.constant 0 : i32
    return %arg0, %c0_i32 : i32, i32
  }
  func.func @transform_3(%arg0: i32) -> (i32, i32) {
    %c0_i32 = arith.constant 0 : i32
    %c0_i32_0 = arith.constant 0 : i32
    %c0_i32_1 = arith.constant 0 : i32
    return %c0_i32, %c0_i32_0 : i32, i32
  }
  func.func @transform_4(%arg0: i32) -> (i32, i32) {
    %c0_i32 = arith.constant 0 : i32
    %c0_i32_0 = arith.constant 0 : i32
    %c0_i32_1 = arith.constant 0 : i32
    return %c0_i32, %c0_i32_0 : i32, i32
  }
  func.func @transform_5(%arg0: i32) -> (i32, i32) {
    %c0_i32 = arith.constant 0 : i32
    %c0_i32_0 = arith.constant 0 : i32
    %c0_i32_1 = arith.constant 0 : i32
    return %c0_i32, %c0_i32_0 : i32, i32
  }
  func.func @transform_6(%arg0: i32) -> (i32, i32) {
    %c0_i32 = arith.constant 0 : i32
    %c0_i32_0 = arith.constant 0 : i32
    return %arg0, %c0_i32 : i32, i32
  }
  func.func @transform_7(%arg0: i32) -> (i32, i32) {
    %c0_i32 = arith.constant 0 : i32
    %c0_i32_0 = arith.constant 0 : i32
    return %arg0, %c0_i32 : i32, i32
  }
}

</mosaic_0001>

<bundles_post_ra>
// kernel: tpu_custom_call.1
= control target key start
LH: loop header
LB: loop body
LE: loop exit
PB: predicated region body
PF: predicated region fallthrough
CT: control target
= control target key end

     0   :  { %s3633_s0 = inlined_call_operand.hbm [shape: bf16[256,128], index: 0, kind: input, shape index: {}]   ;;  %s3634_s1 = inlined_call_operand.hbm [shape: bf16[256,128], index: 1, kind: input, shape index: {}]   ;;  %s3635_s2 = inlined_call_operand.hbm [shape: f32[256,128], index: 2, kind: input, shape index: {}]   ;;  %s3636_s3 = inlined_call_operand.hbm [shape: bf16[128,512], index: 3, kind: input, shape index: {}]   ;;  %s3637_s4 = inlined_call_operand.hbm [shape: bf16[128,512], index: 4, kind: input, shape index: {}]   ;;  %s3638_s5 = inlined_call_operand.vmem [shape: f32[1,512], index: 5, kind: input, shape index: {}]   ;;  %s3639_s6 = inlined_call_operand.hbm [shape: f32[256,128], index: 6, kind: output, shape index: {0}]   ;;  %s3640_s7 = inlined_call_operand.hbm [shape: f32[256,128], index: 7, kind: output, shape index: {1}]  }
   0x1   :  { %3660 = sst [smem:[#allocation23_spill]] %s3634_s1 }
   0x2   :  { %3661 = sst [smem:[#allocation24_spill]] %s3636_s3 }
   0x3   :  { %13 = vsyncpa [#allocation3], 0 }
   0x4   :  { %15 = vsyncpa [#allocation3 + $0x1], 0 }
   0x5   :  { %16 = vsyncpa [#allocation6], 0 }
   0x6   :  { %18 = vsyncpa [#allocation6 + $0x1], 0 }
   0x7   :  { %19 = vsyncpa [#allocation9], 0 }
   0x8   :  { %20 = vsyncpa [#allocation4], 0 }
   0x9   :  { %22 = vsyncpa [#allocation4 + $0x1], 0 }
   0xa   :  { %23 = vsyncpa [#allocation13], 0 }
   0xb   :  { %25 = vsyncpa [#allocation13 + $0x1], 0  ;;  %s2956_s24 = smov 0   ;;  %s2958_s25 = smov 0  }
   0xc   :  { %s2960_s26 = smov 0   ;;  %s2962_s27 = smov 0  }
   0xd LB: > { %3662 = sst [smem:[#allocation19_spill]] %s2894_s26  ;;  %s2977_s28 = sadd.s32 4294967295, %s2898_s27   ;;  %s2898_s27 = sphi %s2962_s27, %s3697_s27   ;;  %s2894_s26 = sphi %s2960_s26, %s3699_s26   ;;  %s2890_s25 = sphi %s2958_s25, %s3701_s25   ;;  %s2886_s24 = sphi %s2956_s24, %s3700_s24  }
   0xe   : > { %s2072_s29 = sadd.s32 4294967294, %s2898_s27   ;;  %s2981_s30 = sadd.s32 1, %s2898_s27  }
   0xf   : > { %3663 = sst [smem:[#allocation20_spill]] %s2981_s30  ;;  %s38_s8 = sadd.s32 1, %s2894_s26 }
  0x10   : > { %s35_s9 = ssub.s32 %s2898_s27, %s2981_s30  ;;  %p45_p0 = scmp.ne.s32.totalorder %s2894_s26, %s2890_s25 }
  0x11   : > { %p36_p1 = scmp.eq.s32.totalorder %s35_s9, 0  ;;  %p46_p2 = scmp.eq.s32.totalorder %s2898_s27, 0 }
  0x12   : > { %p51_p3 = scmp.ne.s32.totalorder %s2890_s25, %s2886_s24  ;;  %p3641_p4 = scmp.eq.s32.totalorder %s2977_s28, 0 }
  0x13   : > { %s2993_s10 = scalar_select %p36_p1, %s2894_s26, %s38_s8  }
  0x14   : > { %p2995_p5 = por %p46_p2, %p45_p0  ;;  %p3001_p6 = por %p3641_p4, %p51_p3 }
  0x15   : > { %3664 = sst [smem:[#allocation21_spill]] %s2993_s10  ;;  %p190_p7 = scmp.eq.s32.totalorder %s2977_s28, 1 }
  0x16   : > { %s3665_s11 = scalar_select %p2995_p5, 1, 0 }
  0x17   : > { %s3666_s12 = scalar_select %p3001_p6, 1, 0 }
  0x18   : > { %p196_p8 = scmp.eq.s32.totalorder %s2072_s29, 1  ;;  %p2073_p9 = scmp.ge.s32.totalorder %s2898_s27, 1 }
  0x19   : > { %p229_p10 = scmp.lt.s32.totalorder %s2898_s27, 3  ;;  %p3008_p11 = por %p190_p7, %p45_p0 }
  0x1a   : > { %p3012_p12 = por %p196_p8, %p51_p3  ;;  %s2900_s16 = smov [#allocation8]  }
  0x1b   : > { %s3667_s13 = scalar_select %p3008_p11, 1, 0 }
  0x1c   : > { %s3668_s14 = scalar_select %p3012_p12, 1, 0 }
  0x1d   : > { %p3016_p13 = pnand %p2073_p9, %p229_p10  ;;  %s241_s17 = sshll.u32 %s2900_s16, 4  ;;  %s242_s17 = int_to_ptr.vmem [resolvable:$true] %s241_s17 }
  0x1e   : > { %3669 = sst [smem:[#allocation22_spill]] %s3668_s14  ;;  %s3031_s19 = sand.u32 1, %s2894_s26  }
  0x1f   : > { %s3670_s15 = scalar_select %p3016_p13, 1, 0 }
  0x20   : > { %p2269_p1 = pneg %p3016_p13  ;;  %s3672_s3 = sld [smem:[#allocation24_spill]] }
  0x22   : > { %p3024_p2 = pnand %p2269_p1, %p3641_p4 }
  0x24   : > { %s3671_s18 = scalar_select %p3024_p2, 1, 0 }
  0x25   : > { %p3650_p8 = pneg %p3024_p2 }
  0x26   : > { %s2646_s23 = scalar_lea.hbm %s3672_s3, 4096 }
  0x27   : > { %p2647_p7 = scmp.ne.s32.totalorder %s3672_s3, %s2646_s23  ;;  %p2653_p1 = scmp.lt.u32.totalorder %s2646_s23, %s3672_s3 }
  0x29   : > { %p2649_p9 = pnand %p3650_p8, %p2647_p7 }
  0x2b   : > { %p2650_p10 = pneg %p2649_p9 }
  0x2d   : > { %p2655_p0 = pnand %p2653_p1, %p2650_p10 }
  0x2f   : > { %2658 = shalt.err (!%p2655_p0)
}
  0x30   : > { %s2659_s20 = scalar_lea.vmem %s242_s17, 4096  ;;  %p2667_p11 = scmp.lt.s32.totalorder %s242_s17, %s242_s17 }
  0x31   : > { %p2660_p4 = scmp.ne.s32.totalorder %s242_s17, %s2659_s20  ;;  %p2668_p6 = scmp.lt.s32.totalorder %s2659_s20, %s2659_s20 }
  0x33   : > { %p2662_p3 = pnand %p2660_p4, %p3650_p8  ;;  %p2669_p13 = por %p2668_p6, %p2667_p11 }
  0x35   : > { %p2663_p12 = pneg %p2662_p3 }
  0x37   : > { %p2670_p5 = pnand %p2669_p13, %p2663_p12 }
  0x39   : > { %2673 = shalt.err (!%p2670_p5)
}
  0x3a   : > { %s3648_s21 = smov 256   ;;  %s3653_s22 = smov 16  }
  0x3b   : > { %2272 = dma.hbm_to_vmem [thread:$0]  (!%p3024_p2), %s3672_s3, 4096, %s242_s17, [#allocation9], %s3648_s21, %s3648_s21, %s3653_s22  }
  0x3c   : > { %s3649_s20 = sshll.u32 %s2898_s27, 10  ;;  %p3673_p4 = scmp.ne.s32.totalorder %s3665_s11, 0 }
  0x3d   : > { %p3674_p5 = scmp.lt.s32.totalorder %s2898_s27, 2  ;;  %s292_s9 = sand.u32 1, %s2898_s27  }
  0x3e   : > { %s3676_s1 = sld [smem:[#allocation23_spill]]  ;;  %s3677_s30 = sshll.u32 %s3031_s19, 6 }
  0x3f   : > { %p3064_p6 = pnand %p3674_p5, %p3673_p4  ;;  %s296_s17 = scalar_lea.vmem [#allocation5], %s3677_s30 }
  0x40   : > { %s303_s11 = sshll.u32 %s296_s17, 4  ;;  %s3080_s23 = scalar_lea.sflag [#allocation6], %s292_s9  ;;  %s3078_s11 = int_to_ptr.vmem [resolvable:$true] %s303_s11 }
  0x41   : > { %s3675_s8 = scalar_select %p3064_p6, 1, 0 }
  0x42   : > { %p3086_p12 = pneg %p3064_p6 }
  0x44   : > { %s3074_s26 = scalar_lea.hbm %s3676_s1, %s3649_s20  ;;  %s2679_s30 = scalar_lea.hbm %s3676_s1, 2048 }
  0x45   : > { %s2674_s29 = scalar_lea.hbm %s3074_s26, 1024  ;;  %p2680_p3 = scmp.lt.u32.totalorder %s3074_s26, %s3676_s1 }
  0x46   : > { %p2675_p11 = scmp.ne.s32.totalorder %s3074_s26, %s2674_s29  ;;  %p2681_p7 = scmp.lt.u32.totalorder %s2679_s30, %s2674_s29 }
  0x47   : > { %s3678_s21 = scalar_select %p3086_p12, 1, 0 }
  0x48   : > { %p2677_p13 = pnand %p3086_p12, %p2675_p11  ;;  %p2682_p9 = por %p2681_p7, %p2680_p3 }
  0x49   : > { %p2683_p10 = scmp.lt.u32.totalorder %s2674_s29, %s3074_s26 }
  0x4a   : > { %p2678_p0 = pneg %p2677_p13 }
  0x4b   : > { %p2684_p1 = por %p2683_p10, %p2682_p9 }
  0x4d   : > { %p2685_p4 = pnand %p2684_p1, %p2678_p0 }
  0x4f   : > { %2688 = shalt.err (!%p2685_p4)
}
  0x50   : > { %s2689_s9 = scalar_lea.vmem %s3078_s11, 1024  ;;  %s2903_s10 = smov [#allocation5]  }
  0x51   : > { %p2690_p5 = scmp.ne.s32.totalorder %s3078_s11, %s2689_s9  ;;  %s2694_s16 = sshll.u32 %s2903_s10, 4  ;;  %s2695_s16 = int_to_ptr.vmem [resolvable:$false] %s2694_s16 }
  0x52   : > { %s2696_s20 = scalar_lea.vmem %s2695_s16, 2048  ;;  %p2697_p8 = scmp.lt.s32.totalorder %s3078_s11, %s2695_s16 }
  0x53   : > { %p2692_p11 = pnand %p2690_p5, %p3086_p12  ;;  %p2698_p2 = scmp.lt.s32.totalorder %s2696_s20, %s2689_s9 }
  0x55   : > { %p2693_p13 = pneg %p2692_p11  ;;  %p2699_p3 = por %p2698_p2, %p2697_p8 }
  0x57   : > { %p2700_p7 = pnand %p2699_p3, %p2693_p13 }
  0x59   : > { %2703 = shalt.err (!%p2700_p7)
}
  0x5a   : > { %s3659_s29 = smov 64   ;;  %s2905_s30 = smov 4  }
  0x5b   : > { %2282 = dma.hbm_to_vmem [thread:$0]  (!%p3064_p6), %s3074_s26, 1024, %s3078_s11, %s3080_s23, %s3659_s29, %s3659_s29, %s2905_s30  }
  0x5c   : > { %s2906_s17 = smov [#allocation10]   ;;  %s2704_s20 = scalar_lea.hbm %s3637_s4, 4096 }
  0x5d   : > { %s254_s10 = sshll.u32 %s2906_s17, 4  ;;  %p2705_p2 = scmp.ne.s32.totalorder %s3637_s4, %s2704_s20  ;;  %s255_s10 = int_to_ptr.vmem [resolvable:$true] %s254_s10 }
  0x5e   : > { %p3679_p8 = scmp.ne.s32.totalorder %s3671_s18, 0  ;;  %p2711_p1 = scmp.lt.u32.totalorder %s2704_s20, %s3637_s4 }
  0x60   : > { %p3680_p0 = pneg %p3679_p8 }
  0x62   : > { %p2707_p9 = pnand %p2705_p2, %p3680_p0 }
  0x64   : > { %p2708_p10 = pneg %p2707_p9 }
  0x66   : > { %p2713_p4 = pnand %p2711_p1, %p2708_p10 }
  0x68   : > { %2716 = shalt.err (!%p2713_p4)
}
  0x69   : > { %s2717_s26 = scalar_lea.vmem %s255_s10, 4096  ;;  %p3681_p11 = pmov %p3680_p0 }
  0x6a   : > { %p2718_p5 = scmp.ne.s32.totalorder %s255_s10, %s2717_s26  ;;  %p2725_p7 = scmp.lt.s32.totalorder %s255_s10, %s255_s10 }
  0x6b   : > { %p2726_p6 = scmp.lt.s32.totalorder %s2717_s26, %s2717_s26 }
  0x6c   : > { %p2720_p13 = pnand %p2718_p5, %p3681_p11 }
  0x6d   : > { %p2727_p12 = por %p2726_p6, %p2725_p7 }
  0x6e   : > { %p2721_p3 = pneg %p2720_p13 }
  0x70   : > { %p2728_p0 = pnand %p2727_p12, %p2721_p3 }
  0x72   : > { %2731 = shalt.err (!%p2728_p0)
}
  0x73   : > { %s3682_s1 = smov 16   ;;  %s3683_s22 = smov 256  }
  0x74   : > { %2275 = dma.hbm_to_vmem [thread:$0]  (!%p3679_p8), %s3637_s4, 4096, %s255_s10, [#allocation9], %s3683_s22, %s3683_s22, %s3682_s1  }
  0x75   : > { %s3684_s11 = sshll.u32 %s2898_s27, 10  ;;  %s3685_s20 = sshll.u32 %s3031_s19, 6 }
  0x76   : > { %s3141_s9 = scalar_lea.hbm %s3633_s0, %s3684_s11  ;;  %s275_s18 = scalar_lea.vmem [#allocation2], %s3685_s20 }
  0x77   : > { %s282_s26 = sshll.u32 %s275_s18, 4  ;;  %s2083_s3 = sshll.u32 %s3031_s19, 7  ;;  %s3145_s26 = int_to_ptr.vmem [resolvable:$true] %s282_s26 }
  0x78   : > { %s272_s14 = scalar_lea.sflag [#allocation3], %s3031_s19  ;;  %s2732_s29 = scalar_lea.hbm %s3141_s9, 1024 }
  0x79   : > { %p2733_p6 = scmp.ne.s32.totalorder %s3141_s9, %s2732_s29  ;;  %p3686_p12 = scmp.ne.s32.totalorder %s3678_s21, 0 }
  0x7a   : > { %s2737_s22 = scalar_lea.hbm %s3633_s0, 2048  ;;  %p2738_p9 = scmp.lt.u32.totalorder %s3141_s9, %s3633_s0 }
  0x7b   : > { %p2735_p2 = pnand %p2733_p6, %p3686_p12  ;;  %p2739_p10 = scmp.lt.u32.totalorder %s2737_s22, %s2732_s29 }
  0x7c   : > { %p2741_p4 = scmp.lt.u32.totalorder %s2732_s29, %s3141_s9 }
  0x7d   : > { %p2736_p8 = pneg %p2735_p2  ;;  %p2740_p1 = por %p2739_p10, %p2738_p9 }
  0x7f   : > { %p2742_p5 = por %p2741_p4, %p2740_p1 }
  0x81   : > { %p2743_p11 = pnand %p2742_p5, %p2736_p8 }
  0x83   : > { %2746 = shalt.err (!%p2743_p11)
}
  0x84   : > { %s2747_s16 = scalar_lea.vmem %s3145_s26, 1024  ;;  %s2907_s20 = smov [#allocation2]  }
  0x85   : > { %p2748_p13 = scmp.ne.s32.totalorder %s3145_s26, %s2747_s16  ;;  %s2752_s18 = sshll.u32 %s2907_s20, 4  ;;  %s2753_s18 = int_to_ptr.vmem [resolvable:$false] %s2752_s18 }
  0x86   : > { %s2754_s10 = scalar_lea.vmem %s2753_s18, 2048  ;;  %p2755_p0 = scmp.lt.s32.totalorder %s3145_s26, %s2753_s18 }
  0x87   : > { %p2750_p3 = pnand %p2748_p13, %p3686_p12  ;;  %p2756_p6 = scmp.lt.s32.totalorder %s2754_s10, %s2747_s16 }
  0x89   : > { %p2751_p7 = pneg %p2750_p3  ;;  %p2757_p2 = por %p2756_p6, %p2755_p0 }
  0x8b   : > { %p2758_p9 = pnand %p2757_p2, %p2751_p7 }
  0x8d   : > { %2761 = shalt.err (!%p2758_p9)
}
  0x8e   : > { %p3687_p8 = scmp.ne.s32.totalorder %s3675_s8, 0  ;;  %s3688_s29 = smov 64  }
  0x8f   : > { %s2184_s1 = sshll.u32 %s2898_s27, 11  ;;  %s317_s16 = scalar_lea.vmem [#allocation7], %s2083_s3 }
  0x90   : > { %2279 = dma.hbm_to_vmem [thread:$0]  (!%p3687_p8), %s3141_s9, 1024, %s3145_s26, %s272_s14, %s3688_s29, %s3688_s29, %s2905_s30  }
  0x91   : > { %s3179_s17 = scalar_lea.hbm %s3635_s2, %s2184_s1  ;;  %s324_s20 = sshll.u32 %s317_s16, 4  ;;  %s3183_s20 = int_to_ptr.vmem [resolvable:$true] %s324_s20 }
  0x92   : > { %s2762_s18 = scalar_lea.hbm %s3179_s17, 2048  ;;  %s2767_s26 = scalar_lea.hbm %s3635_s2, 4096 }
  0x93   : > { %p2763_p10 = scmp.ne.s32.totalorder %s3179_s17, %s2762_s18  ;;  %p2768_p5 = scmp.lt.u32.totalorder %s3179_s17, %s3635_s2 }
  0x94   : > { %p2769_p11 = scmp.lt.u32.totalorder %s2767_s26, %s2762_s18  ;;  %p2771_p3 = scmp.lt.u32.totalorder %s2762_s18, %s3179_s17 }
  0x95   : > { %p2765_p1 = pnand %p2763_p10, %p3686_p12 }
  0x96   : > { %p2770_p13 = por %p2769_p11, %p2768_p5 }
  0x97   : > { %p2766_p4 = pneg %p2765_p1 }
  0x98   : > { %p2772_p7 = por %p2771_p3, %p2770_p13 }
  0x9a   : > { %p2773_p0 = pnand %p2772_p7, %p2766_p4 }
  0x9c   : > { %2776 = shalt.err (!%p2773_p0)
}
  0x9d   : > { %s2777_s19 = scalar_lea.vmem %s3183_s20, 2048  ;;  %s2908_s3 = smov [#allocation7]  }
  0x9e   : > { %p2778_p6 = scmp.ne.s32.totalorder %s3183_s20, %s2777_s19  ;;  %s2782_s29 = sshll.u32 %s2908_s3, 4  ;;  %s2783_s29 = int_to_ptr.vmem [resolvable:$false] %s2782_s29 }
  0x9f   : > { %s2784_s1 = scalar_lea.vmem %s2783_s29, 4096  ;;  %p2785_p10 = scmp.lt.s32.totalorder %s3183_s20, %s2783_s29 }
  0xa0   : > { %p2780_p2 = pnand %p2778_p6, %p3686_p12  ;;  %p2786_p1 = scmp.lt.s32.totalorder %s2784_s1, %s2777_s19 }
  0xa2   : > { %p2781_p9 = pneg %p2780_p2  ;;  %p2787_p5 = por %p2786_p1, %p2785_p10 }
  0xa4   : > { %p2788_p11 = pnand %p2787_p5, %p2781_p9 }
  0xa6   : > { %2791 = shalt.err (!%p2788_p11)
}
  0xa7   : > { %s2909_s22 = smov 128   ;;  %s2910_s11 = smov 8  }
  0xa8   : > { %2285 = dma.hbm_to_vmem [thread:$0]  (!%p3687_p8), %s3179_s17, 2048, %s3183_s20, %s3080_s23, %s2909_s22, %s2909_s22, %s2910_s11  }
  0xa9   : > { %p3689_p12 = scmp.ne.s32.totalorder %s3670_s15, 0 }
  0xaa   : > { %s3210_s21 = sand.u32 (!%p3689_p12), 1, %s2890_s25   ;;  %p3690_p4 = scmp.ne.s32.totalorder (!%p3689_p12), %s3666_s12, 0 }
  0xab   : > { %336 = sbr.rel (%p3689_p12) target bundleno = 668 (0x29c), region = 44  ;;  %s2087_s16 = sshll.u32 (!%p3689_p12), %s3210_s21, 6 }
  0xac   : > { %s339_s18 = scalar_lea.sflag (!%p3689_p12), [#allocation3], %s3210_s21  ;;  %s3214_s30 = scalar_lea.vmem (!%p3689_p12), [#allocation2], %s2087_s16 }
  0xb2   : > { %2865 = dma.done.wait (%p3690_p4), %s339_s18, 1024  }
  0xb3   : > { %2867 = vsyncadd (%p3690_p4), %s339_s18, 4294966272  ;;  %s347_s8 = sand.u32 1, %s2977_s28   ;;  %s3221_s23 = scalar_lea.vmem [#allocation5], %s2087_s16 }
  0xb4   : > { %s348_s15 = scalar_lea.sflag [#allocation6], %s347_s8 }
  0xb5   : > { %2869 = dma.done.wait (%p3690_p4), %s348_s15, 3072  }
  0xb6   : > { %2871 = vsyncadd (%p3690_p4), %s348_s15, 4294964224  ;;  %s3228_s17 = sshll.u32 %s3210_s21, 7  ;;  %p3691_p8 = scmp.eq.s32.totalorder %s2977_s28, 0 }
  0xb7   : > { %s3231_s20 = scalar_lea.vmem [#allocation7], %s3228_s17 }
  0xb8   : > { %2873 = dma.done.wait (%p3691_p8), [#allocation9], 8192   ;;  %p3692_p13 = pmov %p3691_p8 }
  0xb9   : > { %v2911_v0 = vmov 0   ;;  %v2342_v1 = vld [vmem:[#allocation10 + $0x4] ss:$16 sps:$4 sm:$0xff]   ;;  %v2344_v2 = vld [vmem:[#allocation10 + $0xc] ss:$16 sps:$4 sm:$0xff]   ;;  %s3380_s26 = scalar_lea.vmem [#allocation12], %s3228_s17 }
  0xba   : > { %2875 = vsyncadd (%p3692_p13), [#allocation9], 4294959104  ;;  %756 = vmatprep.mubr.bf16.mxu0 %v2911_v0  ;;  %869 = vmatprep.mubr.bf16.mxu1 %v2911_v0  ;;  %v2346_v3 = vld [vmem:[#allocation10] ss:$16 sps:$4 sm:$0xff]   ;;  %v2347_v4 = vld [vmem:[#allocation10 + $0x8] ss:$16 sps:$4 sm:$0xff]  }
  0xbb   : > { %724 = vmatprep.subr.bf16.mxu0 %v2342_v1  ;;  %837 = vmatprep.subr.bf16.mxu1 %v2344_v2  ;;  %v2348_v5 = vld [vmem:[#allocation10 + $0x24] ss:$16 sps:$4 sm:$0xff]   ;;  %v2350_v6 = vld [vmem:[#allocation10 + $0x2c] ss:$16 sps:$4 sm:$0xff]   ;;  %v2352_v7 = vld [vmem:[#allocation10 + $0x20] ss:$16 sps:$4 sm:$0xff]  }
  0xbc   : > { %725 = vmatpush1.bf16.msra.mxu0 %v2346_v3  ;;  %838 = vmatpush1.bf16.msra.mxu1 %v2347_v4  ;;  %v2353_v8 = vld [vmem:[#allocation10 + $0x28] ss:$16 sps:$4 sm:$0xff]   ;;  %v2354_v9 = vld [vmem:[#allocation10 + $0x44] ss:$16 sps:$4 sm:$0xff]   ;;  %v2356_v10 = vld [vmem:[#allocation10 + $0x4c] ss:$16 sps:$4 sm:$0xff]  }
  0xbd   : > { %726 = vmatprep.subr.bf16.mxu0 %v2348_v5  ;;  %839 = vmatprep.subr.bf16.mxu1 %v2350_v6  ;;  %v2358_v11 = vld [vmem:[#allocation10 + $0x40] ss:$16 sps:$4 sm:$0xff]   ;;  %v2359_v12 = vld [vmem:[#allocation10 + $0x48] ss:$16 sps:$4 sm:$0xff]   ;;  %v2360_v13 = vld [vmem:[#allocation10 + $0x64] ss:$16 sps:$4 sm:$0xff]  }
  0xbe   : > { %v2362_v14 = vld [vmem:[#allocation10 + $0x6c] ss:$16 sps:$4 sm:$0xff]   ;;  %v2364_v15 = vld [vmem:[#allocation10 + $0x60] ss:$16 sps:$4 sm:$0xff]   ;;  %v2365_v16 = vld [vmem:[#allocation10 + $0x68] ss:$16 sps:$4 sm:$0xff]  }
  0xbf   : > { %v2366_v17 = vld [vmem:[#allocation10 + $0x84] ss:$16 sps:$4 sm:$0xff]   ;;  %v2368_v18 = vld [vmem:[#allocation10 + $0x8c] ss:$16 sps:$4 sm:$0xff]   ;;  %v2370_v19 = vld [vmem:[#allocation10 + $0x80] ss:$16 sps:$4 sm:$0xff]  }
  0xc0   : > { %727 = vmatpush1.bf16.msra.mxu0 %v2352_v7  ;;  %840 = vmatpush1.bf16.msra.mxu1 %v2353_v8  ;;  %v2371_v20 = vld [vmem:[#allocation10 + $0x88] ss:$16 sps:$4 sm:$0xff]   ;;  %v2372_v21 = vld [vmem:[#allocation10 + $0xa4] ss:$16 sps:$4 sm:$0xff]   ;;  %v2374_v22 = vld [vmem:[#allocation10 + $0xac] ss:$16 sps:$4 sm:$0xff]  }
  0xc1   : > { %728 = vmatprep.subr.bf16.mxu0 %v2354_v9  ;;  %841 = vmatprep.subr.bf16.mxu1 %v2356_v10  ;;  %v2376_v23 = vld [vmem:[#allocation10 + $0xa0] ss:$16 sps:$4 sm:$0xff]   ;;  %v2377_v24 = vld [vmem:[#allocation10 + $0xa8] ss:$16 sps:$4 sm:$0xff]   ;;  %v2378_v25 = vld [vmem:[#allocation10 + $0xc4] ss:$16 sps:$4 sm:$0xff]  }
  0xc2   : > { %v2380_v26 = vld [vmem:[#allocation10 + $0xcc] ss:$16 sps:$4 sm:$0xff]   ;;  %v2382_v27 = vld [vmem:[#allocation10 + $0xc0] ss:$16 sps:$4 sm:$0xff]   ;;  %v2383_v28 = vld [vmem:[#allocation10 + $0xc8] ss:$16 sps:$4 sm:$0xff]  }
  0xc3   : > { %v2384_v29 = vld [vmem:[#allocation10 + $0xe4] ss:$16 sps:$4 sm:$0xff]   ;;  %v2386_v30 = vld [vmem:[#allocation10 + $0xec] ss:$16 sps:$4 sm:$0xff]   ;;  %v2388_v31 = vld [vmem:[#allocation10 + $0xe0] ss:$16 sps:$4 sm:$0xff]  }
  0xc4   : > { %729 = vmatpush1.bf16.msra.mxu0 %v2358_v11  ;;  %842 = vmatpush1.bf16.msra.mxu1 %v2359_v12  ;;  %v2389_v32 = vld [vmem:[#allocation10 + $0xe8] ss:$16 sps:$4 sm:$0xff]   ;;  %v2393_v33 = vld [vmem:[#allocation8 + $0x4] ss:$16 sps:$4 sm:$0xff]   ;;  %v2396_v34 = vld [vmem:[#allocation8 + $0xc] ss:$16 sps:$4 sm:$0xff]  }
  0xc5   : > { %730 = vmatprep.subr.bf16.mxu0 %v2360_v13  ;;  %843 = vmatprep.subr.bf16.mxu1 %v2362_v14  ;;  %v2390_v35 = vld [vmem:[%s3221_s23] sm:$0xff]   ;;  %v2394_v37 = vld [vmem:[#allocation8 + $0x8] ss:$16 sps:$4 sm:$0xff]   ;;  %v2403_v39 = vld [vmem:[#allocation8 + $0x2c] ss:$16 sps:$4 sm:$0xff]   ;;  %s3430_s14 = scalar_lea.vmem [#allocation11], %s3228_s17 }
  0xc6   : > { %v2391_v36 = vld [vmem:[#allocation8] ss:$16 sps:$4 sm:$0xff]   ;;  %v2400_v38 = vld [vmem:[#allocation8 + $0x24] ss:$16 sps:$4 sm:$0xff]   ;;  %v2401_v41 = vld [vmem:[#allocation8 + $0x28] ss:$16 sps:$4 sm:$0xff]  }
  0xc7   : > { %v2398_v40 = vld [vmem:[#allocation8 + $0x20] ss:$16 sps:$4 sm:$0xff]   ;;  %v2407_v42 = vld [vmem:[#allocation8 + $0x44] ss:$16 sps:$4 sm:$0xff]   ;;  %v2410_v43 = vld [vmem:[#allocation8 + $0x4c] ss:$16 sps:$4 sm:$0xff]  }
  0xc8   : > { %731 = vmatpush1.bf16.msra.mxu0 %v2364_v15  ;;  %844 = vmatpush1.bf16.msra.mxu1 %v2365_v16  ;;  %v2397_v44 = vld [vmem:[%s3221_s23 + $0x8] sm:$0xff]   ;;  %v2405_v45 = vld [vmem:[#allocation8 + $0x40] ss:$16 sps:$4 sm:$0xff]   ;;  %v2414_v47 = vld [vmem:[#allocation8 + $0x64] ss:$16 sps:$4 sm:$0xff]   ;;  %s2185_s10 = sshll.u32 %s2977_s28, 11 }
  0xc9   : > { %732 = vmatprep.subr.bf16.mxu0 %v2366_v17  ;;  %845 = vmatprep.subr.bf16.mxu1 %v2368_v18  ;;  %v2408_v46 = vld [vmem:[#allocation8 + $0x48] ss:$16 sps:$4 sm:$0xff]   ;;  %v2417_v48 = vld [vmem:[#allocation8 + $0x6c] ss:$16 sps:$4 sm:$0xff]   ;;  %v2412_v49 = vld [vmem:[#allocation8 + $0x60] ss:$16 sps:$4 sm:$0xff]   ;;  %v1386_v18 = vlaneseq  ;;  %s3543_s1 = scalar_lea.hbm %s3640_s7, %s2185_s10 }
  0xca   : > { %v2415_v50 = vld [vmem:[#allocation8 + $0x68] ss:$16 sps:$4 sm:$0xff]   ;;  %v2421_v51 = vld [vmem:[#allocation8 + $0x84] ss:$16 sps:$4 sm:$0xff]   ;;  %v2424_v52 = vld [vmem:[#allocation8 + $0x8c] ss:$16 sps:$4 sm:$0xff]  }
  0xcb   : > { %v2404_v53 = vld [vmem:[%s3221_s23 + $0x10] sm:$0xff]   ;;  %v2422_v55 = vld [vmem:[#allocation8 + $0x88] ss:$16 sps:$4 sm:$0xff]   ;;  %v2431_v57 = vld [vmem:[#allocation8 + $0xac] ss:$16 sps:$4 sm:$0xff]   ;;  %s1905_s19 = sshll.u32 %s3380_s26, 4  ;;  %s3545_s19 = int_to_ptr.vmem [resolvable:$true] %s1905_s19 }
  0xcc   : > { %733 = vmatpush1.bf16.msra.mxu0 %v2370_v19  ;;  %846 = vmatpush1.bf16.msra.mxu1 %v2371_v20  ;;  %v2419_v54 = vld [vmem:[#allocation8 + $0x80] ss:$16 sps:$4 sm:$0xff]   ;;  %v2428_v56 = vld [vmem:[#allocation8 + $0xa4] ss:$16 sps:$4 sm:$0xff]   ;;  %v2429_v59 = vld [vmem:[#allocation8 + $0xa8] ss:$16 sps:$4 sm:$0xff]  }
  0xcd   : > { %734 = vmatprep.subr.bf16.mxu0 %v2372_v21  ;;  %847 = vmatprep.subr.bf16.mxu1 %v2374_v22  ;;  %v2426_v58 = vld [vmem:[#allocation8 + $0xa0] ss:$16 sps:$4 sm:$0xff]   ;;  %v2435_v60 = vld [vmem:[#allocation8 + $0xc4] ss:$16 sps:$4 sm:$0xff]   ;;  %v2438_v61 = vld [vmem:[#allocation8 + $0xcc] ss:$16 sps:$4 sm:$0xff]  }
  0xce   : > { %v2411_v62 = vld [vmem:[%s3221_s23 + $0x18] sm:$0xff]   ;;  %v2433_v63 = vld [vmem:[#allocation8 + $0xc0] ss:$16 sps:$4 sm:$0xff]   ;;  %v2442_v2 = vld [vmem:[#allocation8 + $0xe4] ss:$16 sps:$4 sm:$0xff]   ;;  %v1387_v19 = vshrl.u32 %v1386_v18, 7 }
  0xcf   : > { %v2436_v1 = vld [vmem:[#allocation8 + $0xc8] ss:$16 sps:$4 sm:$0xff]   ;;  %v2445_v3 = vld [vmem:[#allocation8 + $0xec] ss:$16 sps:$4 sm:$0xff]   ;;  %v2440_v4 = vld [vmem:[#allocation8 + $0xe0] ss:$16 sps:$4 sm:$0xff]  }
  0xd0   : > { %735 = vmatpush1.bf16.msra.mxu0 %v2376_v23  ;;  %848 = vmatpush1.bf16.msra.mxu1 %v2377_v24  ;;  %v2443_v5 = vld [vmem:[#allocation8 + $0xe8] ss:$16 sps:$4 sm:$0xff]   ;;  %v2418_v6 = vld [vmem:[%s3221_s23 + $0x20] sm:$0xff]   ;;  %v2432_v8 = vld [vmem:[%s3221_s23 + $0x30] sm:$0xff]   ;;  %v1388_v20 = vsub.s32 0, %v1387_v19  ;;  %v1392_v22 = vsub.s32 1, %v1387_v19 }
  0xd1   : > { %736 = vmatprep.subr.bf16.mxu0 %v2378_v25  ;;  %849 = vmatprep.subr.bf16.mxu1 %v2380_v26  ;;  %v2425_v7 = vld [vmem:[%s3221_s23 + $0x28] sm:$0xff]   ;;  %v2439_v9 = vld [vmem:[%s3221_s23 + $0x38] sm:$0xff]   ;;  %v2446_v10 = vld [vmem:[%s3214_s30] sm:$0xff]   ;;  %v1400_v24 = vsub.s32 3, %v1387_v19  ;;  %s1876_s22 = scalar_lea.sflag [#allocation13], %s3210_s21  ;;  %s2792_s11 = scalar_lea.vmem %s3545_s19, 2048 }
  0xd2   : > { %v2447_v11 = vld [vmem:[%s3214_s30 + $0x8] sm:$0xff]   ;;  %v2448_v12 = vld [vmem:[%s3214_s30 + $0x10] sm:$0xff]   ;;  %v2449_v13 = vld [vmem:[%s3214_s30 + $0x18] sm:$0xff]   ;;  %p2793_p3 = scmp.ne.s32.totalorder %s3545_s19, %s2792_s11  ;;  %p3693_p7 = scmp.ne.s32.totalorder %s3667_s13, 0 }
  0xd3   : > { %v2450_v14 = vld [vmem:[%s3214_s30 + $0x20] sm:$0xff]   ;;  %v2451_v15 = vld [vmem:[%s3214_s30 + $0x28] sm:$0xff]   ;;  %v2452_v16 = vld [vmem:[%s3214_s30 + $0x30] sm:$0xff]   ;;  %s2912_s16 = smov [#allocation12]  }
  0xd4   : > { %737 = vmatpush1.bf16.msra.mxu0 %v2382_v27  ;;  %850 = vmatpush1.bf16.msra.mxu1 %v2383_v28  ;;  %v2453_v17 = vld [vmem:[%s3214_s30 + $0x38] sm:$0xff]   ;;  %v1384_v21 = vld [vmem:[%s3638_s5] sm:$0xf]  ;;  %p2794_p0 = pnand %p2793_p3, %p3693_p7  ;;  %s2796_s18 = sshll.u32 %s2912_s16, 4  ;;  %s2797_s18 = int_to_ptr.vmem [resolvable:$false] %s2796_s18 }
  0xd5   : > { %738 = vmatprep.subr.bf16.mxu0 %v2384_v29  ;;  %851 = vmatprep.subr.bf16.mxu1 %v2386_v30  ;;  %v3288_v23 = vrot.slane %v1384_v21, %v1388_v20  ;;  %v3290_v25 = vrot.slane %v1384_v21, %v1392_v22  ;;  %v3293_v30 = vrot.slane %v1384_v21, %v1400_v24  ;;  %s2798_s30 = scalar_lea.vmem %s2797_s18, 4096  ;;  %p2799_p2 = scmp.lt.s32.totalorder %s3545_s19, %s2797_s18 }
  0xd6   : > { %p2795_p6 = pneg %p2794_p0  ;;  %p2800_p9 = scmp.lt.s32.totalorder %s2798_s30, %s2792_s11 }
  0xd8   : > { %739 = vmatpush1.bf16.msra.mxu0 %v2388_v31  ;;  %852 = vmatpush1.bf16.msra.mxu1 %v2389_v32  ;;  %p2801_p10 = por %p2800_p9, %p2799_p2 }
  0xd9   : > { %1158 = vmatprep.subr.bf16.mxu0 %v2393_v33  ;;  %1271 = vmatprep.subr.bf16.mxu1 %v2396_v34 }
  0xda   : > { %p2802_p1 = pnand %p2801_p10, %p2795_p6 }
  0xdb   : > { %757 = vmatmul.mubr.bf16.vlgmr.msra.gmra.mrb[0].mxu0 %v2390_v35  ;;  %870 = vmatmul.mubr.bf16.vlgmr.msra.gmra.mrb[0].mxu1 %v2390_v35 }
  0xdc   : > { %1159 = vmatpush1.bf16.msra.mxu0 %v2391_v36  ;;  %766 = vmatprep.mubr.bf16.mxu0 %v2911_v0 }
  0xdd   : > { %879 = vmatprep.mubr.bf16.mxu1 %v2911_v0  ;;  %1272 = vmatpush1.bf16.msra.mxu1 %v2394_v37 }
  0xde   : > { %1160 = vmatprep.subr.bf16.mxu0 %v2400_v38  ;;  %1273 = vmatprep.subr.bf16.mxu1 %v2403_v39 }
  0xe0   : > { %1161 = vmatpush1.bf16.msra.mxu0 %v2398_v40  ;;  %v1396_v40 = vsub.s32 2, %v1387_v19  ;;  %v1678_v19 = vld [vmem:[%s3231_s20] sm:$0xff] }
  0xe1   : > { %1274 = vmatpush1.bf16.msra.mxu1 %v2401_v41  ;;  %1162 = vmatprep.subr.bf16.mxu0 %v2407_v42 }
  0xe2   : > { %1275 = vmatprep.subr.bf16.mxu1 %v2410_v43 }
  0xe3   : > { %767 = vmatmul.mubr.bf16.gmra.mrb[4].mxu0 %v2397_v44  ;;  %880 = vmatmul.mubr.bf16.gmra.mrb[4].mxu1 %v2397_v44 }
  0xe4   : > { %776 = vmatprep.mubr.bf16.mxu0 %v2911_v0  ;;  %889 = vmatprep.mubr.bf16.mxu1 %v2911_v0 }
  0xe5   : > { %1163 = vmatpush1.bf16.msra.mxu0 %v2405_v45  ;;  %1276 = vmatpush1.bf16.msra.mxu1 %v2408_v46 }
  0xe6   : > { %1164 = vmatprep.subr.bf16.mxu0 %v2414_v47  ;;  %1277 = vmatprep.subr.bf16.mxu1 %v2417_v48  ;;  %v3300_v47 = vrot.slane %v1384_v21, %v1396_v40 }
  0xe9   : > { %1165 = vmatpush1.bf16.msra.mxu0 %v2412_v49  ;;  %1278 = vmatpush1.bf16.msra.mxu1 %v2415_v50 }
  0xea   : > { %1166 = vmatprep.subr.bf16.mxu0 %v2421_v51  ;;  %1279 = vmatprep.subr.bf16.mxu1 %v2424_v52 }
  0xeb   : > { %777 = vmatmul.mubr.bf16.gmra.mrb[8].mxu0 %v2404_v53  ;;  %890 = vmatmul.mubr.bf16.gmra.mrb[8].mxu1 %v2404_v53 }
  0xec   : > { %786 = vmatprep.mubr.bf16.mxu0 %v2911_v0  ;;  %899 = vmatprep.mubr.bf16.mxu1 %v2911_v0 }
  0xed   : > { %1167 = vmatpush1.bf16.msra.mxu0 %v2419_v54  ;;  %1280 = vmatpush1.bf16.msra.mxu1 %v2422_v55 }
  0xee   : > { %1168 = vmatprep.subr.bf16.mxu0 %v2428_v56  ;;  %1281 = vmatprep.subr.bf16.mxu1 %v2431_v57 }
  0xf1   : > { %1169 = vmatpush1.bf16.msra.mxu0 %v2426_v58  ;;  %1282 = vmatpush1.bf16.msra.mxu1 %v2429_v59 }
  0xf2   : > { %1170 = vmatprep.subr.bf16.mxu0 %v2435_v60  ;;  %1283 = vmatprep.subr.bf16.mxu1 %v2438_v61 }
  0xf3   : > { %787 = vmatmul.mubr.bf16.gmra.mrb[12].mxu0 %v2411_v62  ;;  %900 = vmatmul.mubr.bf16.gmra.mrb[12].mxu1 %v2411_v62 }
  0xf4   : > { %796 = vmatprep.mubr.bf16.mxu0 %v2911_v0  ;;  %909 = vmatprep.mubr.bf16.mxu1 %v2911_v0 }
  0xf5   : > { %1171 = vmatpush1.bf16.msra.mxu0 %v2433_v63  ;;  %1284 = vmatpush1.bf16.msra.mxu1 %v2436_v1 }
  0xf6   : > { %1172 = vmatprep.subr.bf16.mxu0 %v2442_v2  ;;  %1285 = vmatprep.subr.bf16.mxu1 %v2445_v3 }
  0xf9   : > { %1173 = vmatpush1.bf16.msra.mxu0 %v2440_v4  ;;  %1286 = vmatpush1.bf16.msra.mxu1 %v2443_v5 }
  0xfb   : > { %797 = vmatmul.mubr.bf16.gmra.mrb[16].mxu0 %v2418_v6  ;;  %910 = vmatmul.mubr.bf16.gmra.mrb[16].mxu1 %v2418_v6 }
  0xfc   : > { %806 = vmatprep.mubr.bf16.mxu0 %v2911_v0  ;;  %919 = vmatprep.mubr.bf16.mxu1 %v2911_v0 }
 0x103   : > { %807 = vmatmul.mubr.bf16.gmra.mrb[20].mxu0 %v2425_v7  ;;  %920 = vmatmul.mubr.bf16.gmra.mrb[20].mxu1 %v2425_v7 }
 0x104   : > { %816 = vmatprep.mubr.bf16.mxu0 %v2911_v0  ;;  %929 = vmatprep.mubr.bf16.mxu1 %v2911_v0 }
 0x10b   : > { %817 = vmatmul.mubr.bf16.gmra.mrb[24].mxu0 %v2432_v8  ;;  %930 = vmatmul.mubr.bf16.gmra.mrb[24].mxu1 %v2432_v8 }
 0x10c   : > { %826 = vmatprep.mubr.bf16.mxu0 %v2911_v0  ;;  %939 = vmatprep.mubr.bf16.mxu1 %v2911_v0 }
 0x113   : > { %827 = vmatmul.mubr.bf16.gmra.mrb[28].mxu0 %v2439_v9  ;;  %940 = vmatmul.mubr.bf16.gmra.mrb[28].mxu1 %v2439_v9 }
 0x114   : > { %1190 = vmatprep.mubr.bf16.mxu0 %v2911_v0  ;;  %1303 = vmatprep.mubr.bf16.mxu1 %v2911_v0 }
 0x11b   : > { %1191 = vmatmul.mubr.bf16.vlgmr.msra.gmra.mrb[0].mxu0 %v2446_v10  ;;  %1304 = vmatmul.mubr.bf16.vlgmr.msra.gmra.mrb[0].mxu1 %v2446_v10 }
 0x11c   : > { %1200 = vmatprep.mubr.bf16.mxu0 %v2911_v0  ;;  %1313 = vmatprep.mubr.bf16.mxu1 %v2911_v0 }
 0x123   : > { %1201 = vmatmul.mubr.bf16.gmra.mrb[4].mxu0 %v2447_v11  ;;  %1314 = vmatmul.mubr.bf16.gmra.mrb[4].mxu1 %v2447_v11 }
 0x124   : > { %1210 = vmatprep.mubr.bf16.mxu0 %v2911_v0  ;;  %1323 = vmatprep.mubr.bf16.mxu1 %v2911_v0 }
 0x12b   : > { %1211 = vmatmul.mubr.bf16.gmra.mrb[8].mxu0 %v2448_v12  ;;  %1324 = vmatmul.mubr.bf16.gmra.mrb[8].mxu1 %v2448_v12 }
 0x12c   : > { %1220 = vmatprep.mubr.bf16.mxu0 %v2911_v0  ;;  %1333 = vmatprep.mubr.bf16.mxu1 %v2911_v0 }
 0x133   : > { %1221 = vmatmul.mubr.bf16.gmra.mrb[12].mxu0 %v2449_v13  ;;  %1334 = vmatmul.mubr.bf16.gmra.mrb[12].mxu1 %v2449_v13 }
 0x134   : > { %1230 = vmatprep.mubr.bf16.mxu0 %v2911_v0  ;;  %1343 = vmatprep.mubr.bf16.mxu1 %v2911_v0 }
 0x13b   : > { %1231 = vmatmul.mubr.bf16.gmra.mrb[16].mxu0 %v2450_v14  ;;  %1344 = vmatmul.mubr.bf16.gmra.mrb[16].mxu1 %v2450_v14 }
 0x13c   : > { %1240 = vmatprep.mubr.bf16.mxu0 %v2911_v0  ;;  %1353 = vmatprep.mubr.bf16.mxu1 %v2911_v0 }
 0x143   : > { %1241 = vmatmul.mubr.bf16.gmra.mrb[20].mxu0 %v2451_v15  ;;  %1354 = vmatmul.mubr.bf16.gmra.mrb[20].mxu1 %v2451_v15 }
 0x144   : > { %1250 = vmatprep.mubr.bf16.mxu0 %v2911_v0  ;;  %1363 = vmatprep.mubr.bf16.mxu1 %v2911_v0 }
 0x14b   : > { %1251 = vmatmul.mubr.bf16.gmra.mrb[24].mxu0 %v2452_v16  ;;  %1364 = vmatmul.mubr.bf16.gmra.mrb[24].mxu1 %v2452_v16 }
 0x14c   : > { %1260 = vmatprep.mubr.bf16.mxu0 %v2911_v0  ;;  %1373 = vmatprep.mubr.bf16.mxu1 %v2911_v0 }
 0x153   : > { %1261 = vmatmul.mubr.bf16.gmra.mrb[28].mxu0 %v2453_v17  ;;  %1374 = vmatmul.mubr.bf16.gmra.mrb[28].mxu1 %v2453_v17 }
 0x1ee   : > { %v1192_v26 = vpop.f32.mrb[0].mxu0  ;;  %v1305_v27 = vpop.f32.mrb[0].mxu1 }
 0x1ef   : > { %v1406_v0 = vadd.f32 %v3288_v23, %v1192_v26  ;;  %v1194_v28 = vpop.f32.mrb[1].mxu0  ;;  %v1307_v29 = vpop.f32.mrb[1].mxu1  ;;  %v1408_v60 = vadd.f32 %v3300_v47, %v1305_v27 }
 0x1f0   : > { %v1407_v31 = vadd.f32 %v3290_v25, %v1194_v28  ;;  %v1196_v32 = vpop.f32.mrb[2].mxu0  ;;  %v1309_v33 = vpop.f32.mrb[2].mxu1  ;;  %v1409_v41 = vadd.f32 %v3293_v30, %v1307_v29 }
 0x1f1   : > { %v1470_v34 = vmul.f32 0.5, %v1406_v0  ;;  %v1410_v35 = vadd.f32 %v3288_v23, %v1196_v32  ;;  %v1198_v36 = vpop.f32.mrb[3].mxu0  ;;  %v1311_v37 = vpop.f32.mrb[3].mxu1  ;;  %v1412_v2 = vadd.f32 %v3300_v47, %v1309_v33  ;;  %v1598_v8 = vmul.f32 0.5, %v1408_v60 }
 0x1f2   : > { %v1534_v38 = vmul.f32 0.5, %v1407_v31  ;;  %v1411_v39 = vadd.f32 %v3290_v25, %v1198_v36  ;;  %v1413_v44 = vadd.f32 %v3293_v30, %v1311_v37  ;;  %v1679_v36 = vld [vmem:[%s3231_s20 + $0x8] sm:$0xff] }
 0x1f3   : > { %2454 = vtanh.f32 %v1470_v34  ;;  %v1471_v42 = vmul.f32 0.5, %v1410_v35  ;;  %v1599_v21 = vmul.f32 0.5, %v1412_v2 }
 0x1f4   : > { %v1535_v43 = vmul.f32 0.5, %v1411_v39  ;;  %2456 = vtanh.f32 %v1534_v38 }
 0x1f5   : > { %2458 = vtanh.f32 %v1471_v42 }
 0x1f6   : > { %v1202_v45 = vpop.f32.mrb[4].mxu0  ;;  %v1315_v46 = vpop.f32.mrb[4].mxu1  ;;  %2460 = vtanh.f32 %v1409_v41 }
 0x1f7   : > { %v1414_v48 = vadd.f32 %v3288_v23, %v1202_v45  ;;  %v1204_v49 = vpop.f32.mrb[5].mxu0  ;;  %v1317_v50 = vpop.f32.mrb[5].mxu1  ;;  %2462 = vtanh.f32 %v1535_v43  ;;  %v1416_v29 = vadd.f32 %v3300_v47, %v1315_v46 }
 0x1f8   : > { %v1415_v51 = vadd.f32 %v3290_v25, %v1204_v49  ;;  %v1206_v52 = vpop.f32.mrb[6].mxu0  ;;  %v3304_v53 = vpop.f32.mrb[6].mxu1  ;;  %2464 = vtanh.f32 %v1413_v44  ;;  %v1417_v61 = vadd.f32 %v3293_v30, %v1317_v50 }
 0x1f9   : > { %v1472_v54 = vmul.f32 0.5, %v1414_v48  ;;  %v1418_v55 = vadd.f32 %v3288_v23, %v1206_v52  ;;  %v1208_v56 = vpop.f32.mrb[7].mxu0  ;;  %v1321_v57 = vpop.f32.mrb[7].mxu1  ;;  %v1600_v44 = vmul.f32 0.5, %v1416_v29  ;;  %v1420_v50 = vadd.f32 %v3300_v47, %v3304_v53 }
 0x1fa   : > { %v1536_v58 = vmul.f32 0.5, %v1415_v51  ;;  %v1419_v59 = vadd.f32 %v3290_v25, %v1208_v56  ;;  %v1421_v4 = vadd.f32 %v3293_v30, %v1321_v57 }
 0x1fb   : > { %2466 = vtanh.f32 %v1472_v54  ;;  %v1473_v62 = vmul.f32 0.5, %v1418_v55 }
 0x1fc   : > { %v1537_v63 = vmul.f32 0.5, %v1419_v59  ;;  %2468 = vtanh.f32 %v1536_v58 }
 0x1fd   : > { %v2455_v1 = vpop.eup %2454  ;;  %2470 = vtanh.f32 %v1473_v62 }
 0x1fe   : > { %v1502_v3 = vmul.f32 0.5, %v2455_v1  ;;  %v1212_v5 = vpop.f32.mrb[8].mxu0  ;;  %v3312_v6 = vpop.f32.mrb[8].mxu1  ;;  %2472 = vtanh.f32 %v1417_v61  ;;  %v1680_v1 = vld [vmem:[%s3231_s20 + $0x10] sm:$0xff] }
 0x1ff   : > { %v2457_v7 = vpop.eup %2456  ;;  %v1422_v9 = vadd.f32 %v3288_v23, %v1212_v5  ;;  %v1214_v10 = vpop.f32.mrb[9].mxu0  ;;  %2474 = vtanh.f32 %v1537_v63 }
 0x200   : > { %v1327_v11 = vpop.f32.mrb[9].mxu1  ;;  %v2459_v12 = vpop.eup %2458  ;;  %v1518_v13 = vadd.f32 0.5, %v1502_v3  ;;  %v1566_v14 = vmul.f32 0.5, %v2457_v7  ;;  %v1423_v15 = vadd.f32 %v3290_v25, %v1214_v10  ;;  %2476 = vtanh.f32 %v1421_v4 }
 0x201   : > { %v1216_v16 = vpop.f32.mrb[10].mxu0  ;;  %v3316_v17 = vpop.f32.mrb[10].mxu1  ;;  %v1503_v20 = vmul.f32 0.5, %v2459_v12  ;;  %v1474_v22 = vmul.f32 0.5, %v1422_v9  ;;  %v1425_v37 = vadd.f32 %v3293_v30, %v1327_v11 }
 0x202   : > { %v2461_v18 = vpop.eup %2460  ;;  %v1218_v24 = vpop.f32.mrb[11].mxu0  ;;  %v1582_v0 = vadd.f32 0.5, %v1566_v14  ;;  %v1538_v33 = vmul.f32 0.5, %v1423_v15  ;;  %v1426_v41 = vadd.f32 %v3288_v23, %v1216_v16  ;;  %v1681_v14 = vld [vmem:[%s3231_s20 + $0x18] sm:$0xff] }
 0x203   : > { %v1331_v26 = vpop.f32.mrb[11].mxu1  ;;  %v2463_v27 = vpop.eup %2462  ;;  %v1710_v28 = vmul.f32 %v2461_v18, %v1518_v13  ;;  %v1519_v31 = vadd.f32 0.5, %v1503_v20  ;;  %2478 = vtanh.f32 %v1474_v22  ;;  %v1427_v59 = vadd.f32 %v3290_v25, %v1218_v24 }
 0x204   : > { %v1567_v32 = vmul.f32 0.5, %v2463_v27  ;;  %v2465_v34 = vpop.eup %2464  ;;  %2480 = vtanh.f32 %v1598_v8  ;;  %v1694_v35 = vmul.f32 %v1678_v19, %v1582_v0  ;;  %v1475_v51 = vmul.f32 0.5, %v1426_v41 }
 0x205   : > { %v2467_v38 = vpop.eup %2466  ;;  %v1711_v40 = vmul.f32 %v2465_v34, %v1519_v31  ;;  %2482 = vtanh.f32 %v1538_v33  ;;  %v1601_v13 = vmul.f32 0.5, %v1420_v50  ;;  %v1539_v15 = vmul.f32 0.5, %v1427_v59 }
 0x206   : > { %v1583_v39 = vadd.f32 0.5, %v1567_v32  ;;  %v1726_v42 = vadd.f32 %v1710_v28, %v1694_v35  ;;  %2484 = vtanh.f32 %v1599_v21  ;;  %v1504_v43 = vmul.f32 0.5, %v2467_v38  ;;  %v1222_v45 = vpop.f32.mrb[12].mxu0  ;;  %v3323_v46 = vpop.f32.mrb[12].mxu1 }
 0x207   : > { %v2469_v48 = vpop.eup %2468  ;;  %2486 = vtanh.f32 %v1425_v37  ;;  %v1224_v52 = vpop.f32.mrb[13].mxu0  ;;  %v1429_v16 = vadd.f32 %v3293_v30, %v1331_v26  ;;  %v1430_v21 = vadd.f32 %v3288_v23, %v1222_v45 }
 0x208   : > { %v1695_v49 = vmul.f32 %v1679_v36, %v1583_v39  ;;  %v3327_v54 = vpop.f32.mrb[13].mxu1  ;;  %v2471_v55 = vpop.eup %2470  ;;  %v1742_v56 = vmul.f32 0.5, %v1726_v42  ;;  %v1520_v57 = vadd.f32 0.5, %v1504_v43  ;;  %v1568_v58 = vmul.f32 0.5, %v2469_v48  ;;  %v1682_v42 = vld [vmem:[%s3231_s20 + $0x20] sm:$0xff] }
 0x209   : > { %v1226_v60 = vpop.f32.mrb[14].mxu0  ;;  %v3330_v61 = vpop.f32.mrb[14].mxu1  ;;  %v1505_v2 = vmul.f32 0.5, %v2471_v55  ;;  %2488 = vtanh.f32 %v1475_v51  ;;  %v1476_v32 = vmul.f32 0.5, %v1430_v21  ;;  %v1431_v43 = vadd.f32 %v3290_v25, %v1224_v52 }
 0x20a   : > { %v2473_v62 = vpop.eup %2472  ;;  %v1727_v63 = vadd.f32 %v1711_v40, %v1695_v49  ;;  %v3333_v53 = vpop.f32.mrb[15].mxu0  ;;  %2490 = vtanh.f32 %v1742_v56  ;;  %v1584_v5 = vadd.f32 0.5, %v1568_v58  ;;  %v1433_v50 = vadd.f32 %v3293_v30, %v3327_v54 }
 0x20b   : > { %v3335_v3 = vpop.f32.mrb[15].mxu1  ;;  %v2475_v4 = vpop.eup %2474  ;;  %v1712_v7 = vmul.f32 %v2473_v62, %v1520_v57  ;;  %2492 = vtanh.f32 %v1600_v44  ;;  %v1521_v9 = vadd.f32 0.5, %v1505_v2  ;;  %v1424_v56 = vadd.f32 %v3300_v47, %v3312_v6 }
 0x20c   : > { %v1743_v8 = vmul.f32 0.5, %v1727_v63  ;;  %v1569_v10 = vmul.f32 0.5, %v2475_v4  ;;  %v2477_v11 = vpop.eup %2476  ;;  %v1696_v12 = vmul.f32 %v1680_v1, %v1584_v5  ;;  %v1540_v57 = vmul.f32 0.5, %v1431_v43 }
 0x20d   : > { %v2479_v18 = vpop.eup %2478  ;;  %v1713_v20 = vmul.f32 %v2477_v11, %v1521_v9  ;;  %v1434_v58 = vadd.f32 %v3288_v23, %v1226_v60  ;;  %v1435_v54 = vadd.f32 %v3290_v25, %v3333_v53 }
 0x20e   : > { %2494 = vtanh.f32 %v1743_v8  ;;  %v1585_v19 = vadd.f32 0.5, %v1569_v10  ;;  %v2481_v22 = vpop.eup %2480  ;;  %v1728_v24 = vadd.f32 %v1712_v7, %v1696_v12  ;;  %v1506_v27 = vmul.f32 0.5, %v2479_v18  ;;  %v3340_v0 = vpop.f32.mrb[16].mxu0 }
 0x20f   : > { %2496 = vtanh.f32 %v1539_v15  ;;  %v3342_v28 = vpop.f32.mrb[16].mxu1  ;;  %v2483_v29 = vpop.eup %2482  ;;  %v1477_v2 = vmul.f32 0.5, %v1434_v58  ;;  %v1630_v8 = vmul.f32 0.5, %v2481_v22  ;;  %v1602_v10 = vmul.f32 0.5, %v1424_v56 }
 0x210   : > { %v1697_v31 = vmul.f32 %v1681_v14, %v1585_v19  ;;  %2498 = vtanh.f32 %v1429_v16  ;;  %v3344_v26 = vpop.f32.mrb[17].mxu0  ;;  %v3346_v33 = vpop.f32.mrb[17].mxu1  ;;  %v1744_v35 = vmul.f32 0.5, %v1728_v24  ;;  %v1522_v36 = vadd.f32 0.5, %v1506_v27 }
 0x211   : > { %v2485_v34 = vpop.eup %2484  ;;  %2500 = vtanh.f32 %v1601_v13  ;;  %v1570_v37 = vmul.f32 0.5, %v2483_v29  ;;  %v3348_v38 = vpop.f32.mrb[18].mxu0  ;;  %v1541_v16 = vmul.f32 0.5, %v1435_v54  ;;  %v1437_v22 = vadd.f32 %v3293_v30, %v3335_v3 }
 0x212   : > { %v3350_v39 = vpop.f32.mrb[18].mxu1  ;;  %v2487_v40 = vpop.eup %2486  ;;  %v1729_v41 = vadd.f32 %v1713_v20, %v1697_v31  ;;  %2502 = vtanh.f32 %v1476_v32  ;;  %v1631_v14 = vmul.f32 0.5, %v2485_v34  ;;  %v1438_v24 = vadd.f32 %v3288_v23, %v3340_v0  ;;  %v1683_v34 = vld [vmem:[%s3231_s20 + $0x28] sm:$0xff] }
 0x213   : > { %v3354_v44 = vpop.f32.mrb[19].mxu0  ;;  %v3356_v45 = vpop.f32.mrb[19].mxu1  ;;  %2504 = vtanh.f32 %v1744_v35  ;;  %v1586_v48 = vadd.f32 0.5, %v1570_v37  ;;  %v1714_v49 = vmul.f32 %v2487_v40, %v1522_v36  ;;  %v1439_v36 = vadd.f32 %v3290_v25, %v3344_v26 }
 0x214   : > { %v2489_v51 = vpop.eup %2488  ;;  %v1745_v55 = vmul.f32 0.5, %v1729_v41  ;;  %2506 = vtanh.f32 %v1433_v50  ;;  %v1478_v40 = vmul.f32 0.5, %v1438_v24  ;;  %v1646_v0 = vadd.f32 0.5, %v1630_v8 }
 0x215   : > { %v2491_v59 = vpop.eup %2490  ;;  %v1698_v52 = vmul.f32 %v1682_v42, %v1586_v48  ;;  %v1507_v62 = vmul.f32 0.5, %v2489_v51  ;;  %v1647_v51 = vadd.f32 0.5, %v1631_v14  ;;  %v1542_v26 = vmul.f32 0.5, %v1439_v36 }
 0x216   : > { %v3363_v63 = vpop.eup %2492  ;;  %v1774_v1 = vmul.f32 0.5, %v2491_v59  ;;  %2508 = vtanh.f32 %v1745_v55  ;;  %v3367_v7 = vpop.f32.mrb[20].mxu0  ;;  %v1432_v24 = vadd.f32 %v3300_v47, %v3323_v46 }
 0x217   : > { %v1730_v4 = vadd.f32 %v1714_v49, %v1698_v52  ;;  %v1523_v5 = vadd.f32 0.5, %v1507_v62  ;;  %2510 = vtanh.f32 %v1540_v57  ;;  %v3369_v6 = vpop.f32.mrb[20].mxu1  ;;  %v3371_v11 = vpop.f32.mrb[21].mxu0  ;;  %v1442_v49 = vadd.f32 %v3288_v23, %v3348_v38 }
 0x218   : > { %v2495_v60 = vpop.eup %2494  ;;  %v1790_v9 = vadd.f32 0.5, %v1774_v1  ;;  %2512 = vtanh.f32 %v1477_v2  ;;  %v3373_v12 = vpop.f32.mrb[21].mxu1  ;;  %v1428_v52 = vadd.f32 %v3300_v47, %v3316_v17  ;;  %v1632_v54 = vmul.f32 0.5, %v3363_v63 }
 0x219   : > { %v2497_v13 = vpop.eup %2496  ;;  %v1775_v53 = vmul.f32 0.5, %v2495_v60  ;;  %v1746_v15 = vmul.f32 0.5, %v1730_v4  ;;  %v3375_v18 = vpop.f32.mrb[22].mxu0  ;;  %v1441_v60 = vadd.f32 %v3293_v30, %v3346_v33  ;;  %v1479_v14 = vmul.f32 0.5, %v1442_v49 }
 0x21a   : > { %v3377_v19 = vpop.f32.mrb[22].mxu1  ;;  %v2499_v20 = vpop.eup %2498  ;;  %2514 = vtanh.f32 %v1790_v9  ;;  %1854 = vst [vmem:[%s3380_s26] sm:$0xff] %v1790_v9  ;;  %v1571_v21 = vmul.f32 0.5, %v2497_v13  ;;  %v1443_v33 = vadd.f32 %v3290_v25, %v3354_v44 }
 0x21b   : > { %v3387_v27 = vpop.f32.mrb[23].mxu0  ;;  %v3389_v29 = vpop.f32.mrb[23].mxu1  ;;  %v1791_v32 = vadd.f32 0.5, %v1775_v53  ;;  %2516 = vtanh.f32 %v1746_v15  ;;  %v1715_v35 = vmul.f32 %v2499_v20, %v1523_v5 }
 0x21c   : > { %v3391_v31 = vpop.eup %2500  ;;  %2518 = vtanh.f32 %v1602_v10  ;;  %v1587_v3 = vadd.f32 0.5, %v1571_v21  ;;  %v1543_v36 = vmul.f32 0.5, %v1443_v33  ;;  %v1449_v33 = vadd.f32 %v3293_v30, %v3373_v12 }
 0x21d   : > { %v2503_v37 = vpop.eup %2502  ;;  %2520 = vtanh.f32 %v1791_v32  ;;  %1855 = vst [vmem:[%s3380_s26 + $0x8] sm:$0xff] %v1791_v32  ;;  %v1633_v46 = vmul.f32 0.5, %v3391_v31  ;;  %v1436_v12 = vadd.f32 %v3300_v47, %v3330_v61 }
 0x21e   : > { %v2505_v41 = vpop.eup %2504  ;;  %v1508_v42 = vmul.f32 0.5, %v2503_v37  ;;  %v1699_v48 = vmul.f32 %v1683_v34, %v1587_v3  ;;  %2522 = vtanh.f32 %v1541_v16  ;;  %v3399_v56 = vpop.f32.mrb[24].mxu0  ;;  %v1684_v16 = vld [vmem:[%s3231_s20 + $0x30] sm:$0xff]  ;;  %v1446_v37 = vadd.f32 %v3288_v23, %v3367_v7 }
 0x21f   : > { %v1776_v43 = vmul.f32 0.5, %v2505_v41  ;;  %v2507_v50 = vpop.eup %2506  ;;  %2524 = vtanh.f32 %v1437_v22  ;;  %v3401_v57 = vpop.f32.mrb[24].mxu1  ;;  %v1603_v22 = vmul.f32 0.5, %v1428_v52 }
 0x220   : > { %v1524_v55 = vadd.f32 0.5, %v1508_v42  ;;  %v2509_v58 = vpop.eup %2508  ;;  %v1731_v62 = vadd.f32 %v1715_v35, %v1699_v48  ;;  %2526 = vtanh.f32 %v1478_v40  ;;  %v3405_v1 = vpop.f32.mrb[25].mxu0 }
 0x221   : > { %v1792_v59 = vadd.f32 0.5, %v1776_v43  ;;  %v3407_v38 = vpop.f32.mrb[25].mxu1  ;;  %v2511_v2 = vpop.eup %2510  ;;  %v1777_v4 = vmul.f32 0.5, %v2509_v58  ;;  %v1447_v43 = vadd.f32 %v3290_v25, %v3371_v11  ;;  %v1480_v11 = vmul.f32 0.5, %v1446_v37 }
 0x222   : > { %v1716_v5 = vmul.f32 %v2507_v50, %v1524_v55  ;;  %v3412_v8 = vpop.f32.mrb[26].mxu0  ;;  %v3414_v9 = vpop.f32.mrb[26].mxu1  ;;  %v1747_v10 = vmul.f32 0.5, %v1731_v62  ;;  %v1572_v13 = vmul.f32 0.5, %v2511_v2 }
 0x223   : > { %v2513_v17 = vpop.eup %2512  ;;  %2528 = vtanh.f32 %v1792_v59  ;;  %1856 = vst [vmem:[%s3380_s26 + $0x10] sm:$0xff] %v1792_v59  ;;  %v3417_v53 = vpop.f32.mrb[27].mxu0  ;;  %v1793_v63 = vadd.f32 0.5, %v1777_v4  ;;  %v1648_v59 = vadd.f32 0.5, %v1632_v54 }
 0x224   : > { %v3419_v15 = vpop.f32.mrb[27].mxu1  ;;  %v1509_v20 = vmul.f32 0.5, %v2513_v17  ;;  %2530 = vtanh.f32 %v1542_v26  ;;  %v2515_v21 = vpop.eup %2514  ;;  %v1588_v32 = vadd.f32 0.5, %v1572_v13 }
 0x225   : > { %2532 = vtanh.f32 %v1747_v10  ;;  %v2517_v34 = vpop.eup %2516  ;;  %v1822_v35 = vmul.f32 %v2515_v21, %v1646_v0  ;;  %1857 = vst [vmem:[%s3380_s26 + $0x18] sm:$0xff] %v1793_v63  ;;  %v1445_v0 = vadd.f32 %v3293_v30, %v3356_v45  ;;  %v1450_v21 = vadd.f32 %v3288_v23, %v3375_v18  ;;  %v1686_v18 = vld [vmem:[%s3231_s20 + $0x40] sm:$0xff] }
 0x226   : > { %2534 = vtanh.f32 %v1793_v63  ;;  %v2519_v3 = vpop.eup %2518  ;;  %v1778_v40 = vmul.f32 0.5, %v2517_v34  ;;  %v1700_v41 = vmul.f32 %v1684_v16, %v1588_v32  ;;  %v1525_v44 = vadd.f32 0.5, %v1509_v20  ;;  %v3438_v7 = vpop.f32.mrb[28].mxu0 }
 0x227   : > { %2536 = vtanh.f32 %v1441_v60  ;;  %v2521_v42 = vpop.eup %2520  ;;  %1838 = vst [vmem:[%s3430_s14] sm:$0xff] %v1822_v35  ;;  %v3440_v48 = vpop.f32.mrb[28].mxu1  ;;  %v1685_v60 = vld [vmem:[%s3231_s20 + $0x38] sm:$0xff]  ;;  %v1544_v63 = vmul.f32 0.5, %v1447_v43  ;;  %v1649_v20 = vadd.f32 0.5, %v1633_v46 }
 0x228   : > { %2538 = vtanh.f32 %v1479_v14  ;;  %v2523_v49 = vpop.eup %2522  ;;  %v1823_v50 = vmul.f32 %v2521_v42, %v1647_v51  ;;  %v1794_v55 = vadd.f32 0.5, %v1778_v40  ;;  %v1732_v26 = vadd.f32 %v1716_v5, %v1700_v41  ;;  %v3442_v31 = vpop.f32.mrb[29].mxu0 }
 0x229   : > { %2540 = vtanh.f32 %v1603_v22  ;;  %v3444_v58 = vpop.f32.mrb[29].mxu1  ;;  %v2525_v45 = vpop.eup %2524  ;;  %v1573_v52 = vmul.f32 0.5, %v2523_v49  ;;  %v1604_v51 = vmul.f32 0.5, %v1432_v24  ;;  %v1481_v40 = vmul.f32 0.5, %v1450_v21 }
 0x22a   : > { %2542 = vtanh.f32 %v1543_v36  ;;  %v3446_v62 = vpop.f32.mrb[30].mxu0  ;;  %v3448_v2 = vpop.f32.mrb[30].mxu1  ;;  %1839 = vst [vmem:[%s3430_s14 + $0x8] sm:$0xff] %v1823_v50  ;;  %1858 = vst [vmem:[%s3380_s26 + $0x20] sm:$0xff] %v1794_v55  ;;  %v1748_v5 = vmul.f32 0.5, %v1732_v26  ;;  %v1717_v17 = vmul.f32 %v2525_v45, %v1525_v44  ;;  %v1634_v36 = vmul.f32 0.5, %v2519_v3 }
 0x22b   : > { %v2527_v4 = vpop.eup %2526  ;;  %2544 = vtanh.f32 %v1794_v55  ;;  %v3453_v10 = vpop.f32.mrb[31].mxu0  ;;  %v1589_v54 = vadd.f32 0.5, %v1573_v52  ;;  %v1451_v3 = vadd.f32 %v3290_v25, %v3387_v27  ;;  %v1454_v27 = vadd.f32 %v3288_v23, %v3399_v56 }
 0x22c   : > { %v3455_v13 = vpop.f32.mrb[31].mxu1  ;;  %v1510_v14 = vmul.f32 0.5, %v2527_v4  ;;  %2546 = vtanh.f32 %v1445_v0 }
 0x22d   : > { %v2529_v16 = vpop.eup %2528  ;;  %2548 = vtanh.f32 %v1748_v5  ;;  %v1701_v32 = vmul.f32 %v1685_v60, %v1589_v54  ;;  %v1453_v5 = vadd.f32 %v3293_v30, %v3389_v29  ;;  %v1482_v21 = vmul.f32 0.5, %v1454_v27 }
 0x22e   : > { %v2531_v22 = vpop.eup %2530  ;;  %v1824_v24 = vmul.f32 %v2529_v16, %v1648_v59  ;;  %v1526_v34 = vadd.f32 0.5, %v1510_v14  ;;  %2550 = vtanh.f32 %v1480_v11  ;;  %v1650_v59 = vadd.f32 0.5, %v1634_v36 }
 0x22f   : > { %v2533_v35 = vpop.eup %2532  ;;  %2552 = vtanh.f32 %v1604_v51  ;;  %v1574_v37 = vmul.f32 0.5, %v2531_v22  ;;  %v1733_v42 = vadd.f32 %v1717_v17, %v1701_v32  ;;  %v1545_v11 = vmul.f32 0.5, %v1451_v3 }
 0x230   : > { %v2535_v41 = vpop.eup %2534  ;;  %1840 = vst [vmem:[%s3430_s14 + $0x10] sm:$0xff] %v1824_v24  ;;  %v1779_v44 = vmul.f32 0.5, %v2533_v35  ;;  %2554 = vtanh.f32 %v1544_v63  ;;  %v1605_v51 = vmul.f32 0.5, %v1436_v12  ;;  %v1455_v36 = vadd.f32 %v3290_v25, %v3405_v1 }
 0x231   : > { %v2537_v46 = vpop.eup %2536  ;;  %v1825_v0 = vmul.f32 %v2535_v41, %v1649_v20  ;;  %v1590_v43 = vadd.f32 0.5, %v1574_v37  ;;  %2556 = vtanh.f32 %v1449_v33  ;;  %v1749_v55 = vmul.f32 0.5, %v1733_v42  ;;  %v1687_v33 = vld [vmem:[%s3231_s20 + $0x48] sm:$0xff] }
 0x232   : > { %v2539_v49 = vpop.eup %2538  ;;  %v1795_v50 = vadd.f32 0.5, %v1779_v44  ;;  %v1718_v26 = vmul.f32 %v2537_v46, %v1526_v34  ;;  %2558 = vtanh.f32 %v1481_v40  ;;  %v1440_v20 = vadd.f32 %v3300_v47, %v3342_v28 }
 0x233   : > { %v2541_v45 = vpop.eup %2540  ;;  %1841 = vst [vmem:[%s3430_s14 + $0x18] sm:$0xff] %v1825_v0  ;;  %v1702_v61 = vmul.f32 %v1686_v18, %v1590_v43  ;;  %v1511_v52 = vmul.f32 0.5, %v2539_v49  ;;  %v1457_v41 = vadd.f32 %v3293_v30, %v3407_v38  ;;  %v1444_v18 = vadd.f32 %v3300_v47, %v3350_v39 }
 0x234   : > { %v2543_v4 = vpop.eup %2542  ;;  %2560 = vtanh.f32 %v1795_v50  ;;  %1859 = vst [vmem:[%s3380_s26 + $0x28] sm:$0xff] %v1795_v50  ;;  %v1635_v34 = vmul.f32 0.5, %v2541_v45  ;;  %v1606_v42 = vmul.f32 0.5, %v1440_v20  ;;  %v1688_v50 = vld [vmem:[%s3231_s20 + $0x50] sm:$0xff]  ;;  %v1458_v38 = vadd.f32 %v3288_v23, %v3412_v8 }
 0x235   : > { %v2545_v60 = vpop.eup %2544  ;;  %2562 = vtanh.f32 %v1749_v55  ;;  %v1734_v17 = vadd.f32 %v1718_v26, %v1702_v61  ;;  %v1527_v54 = vadd.f32 0.5, %v1511_v52  ;;  %v1575_v14 = vmul.f32 0.5, %v2543_v4 }
 0x236   : > { %v2547_v63 = vpop.eup %2546  ;;  %v1826_v16 = vmul.f32 %v2545_v60, %v1650_v59  ;;  %2564 = vtanh.f32 %v1545_v11  ;;  %v1651_v49 = vadd.f32 0.5, %v1635_v34  ;;  %v1546_v55 = vmul.f32 0.5, %v1455_v36 }
 0x237   : > { %v2549_v22 = vpop.eup %2548  ;;  %v1750_v24 = vmul.f32 0.5, %v1734_v17  ;;  %v1591_v29 = vadd.f32 0.5, %v1575_v14  ;;  %v1719_v32 = vmul.f32 %v2547_v63, %v1527_v54  ;;  %2566 = vtanh.f32 %v1453_v5 }
 0x238   : > { %v2551_v56 = vpop.eup %2550  ;;  %1842 = vst [vmem:[%s3430_s14 + $0x20] sm:$0xff] %v1826_v16  ;;  %v1780_v35 = vmul.f32 0.5, %v2549_v22  ;;  %2568 = vtanh.f32 %v1482_v21  ;;  %v1607_v11 = vmul.f32 0.5, %v1444_v18  ;;  %v1483_v4 = vmul.f32 0.5, %v1458_v38 }
 0x239   : > { %v2553_v37 = vpop.eup %2552  ;;  %2570 = vtanh.f32 %v1750_v24  ;;  %v1703_v40 = vmul.f32 %v1687_v33, %v1591_v29  ;;  %v1512_v28 = vmul.f32 0.5, %v2551_v56  ;;  %v1448_v8 = vadd.f32 %v3300_v47, %v3369_v6  ;;  %v1689_v24 = vld [vmem:[%s3231_s20 + $0x58] sm:$0xff] }
 0x23a   : > { %v2555_v44 = vpop.eup %2554  ;;  %v1796_v12 = vadd.f32 0.5, %v1780_v35  ;;  %2572 = vtanh.f32 %v1605_v51  ;;  %v1636_v39 = vmul.f32 0.5, %v2553_v37  ;;  %v1459_v14 = vadd.f32 %v3290_v25, %v3417_v53 }
 0x23b   : > { %v2557_v46 = vpop.eup %2556  ;;  %v1735_v0 = vadd.f32 %v1719_v32, %v1703_v40  ;;  %v1528_v43 = vadd.f32 0.5, %v1512_v28  ;;  %v1576_v1 = vmul.f32 0.5, %v2555_v44  ;;  %2574 = vtanh.f32 %v1457_v41 }
 0x23c   : > { %v2559_v3 = vpop.eup %2558  ;;  %2576 = vtanh.f32 %v1796_v12  ;;  %1860 = vst [vmem:[%s3380_s26 + $0x30] sm:$0xff] %v1796_v12  ;;  %v1461_v33 = vadd.f32 %v3293_v30, %v3419_v15  ;;  %v1547_v32 = vmul.f32 0.5, %v1459_v14  ;;  %v1652_v36 = vadd.f32 0.5, %v1636_v39 }
 0x23d   : > { %v1751_v26 = vmul.f32 0.5, %v1735_v0  ;;  %v1592_v45 = vadd.f32 0.5, %v1576_v1  ;;  %v1720_v59 = vmul.f32 %v2557_v46, %v1528_v43  ;;  %v1513_v61 = vmul.f32 0.5, %v2559_v3 }
 0x23e   : > { %v2561_v52 = vpop.eup %2560  ;;  %2578 = vtanh.f32 %v1606_v42  ;;  %v1462_v40 = vadd.f32 %v3288_v23, %v3438_v7  ;;  %v1463_v44 = vadd.f32 %v3290_v25, %v3442_v31  ;;  %v1608_v18 = vmul.f32 0.5, %v1448_v8 }
 0x23f   : > { %v2563_v51 = vpop.eup %2562  ;;  %v1827_v5 = vmul.f32 %v2561_v52, %v1651_v49  ;;  %2580 = vtanh.f32 %v1751_v26  ;;  %v1704_v27 = vmul.f32 %v1688_v50, %v1592_v45  ;;  %v1529_v60 = vadd.f32 0.5, %v1513_v61 }
 0x240   : > { %v2565_v17 = vpop.eup %2564  ;;  %v1781_v54 = vmul.f32 0.5, %v2563_v51  ;;  %2582 = vtanh.f32 %v1546_v55  ;;  %v1484_v46 = vmul.f32 0.5, %v1462_v40  ;;  %v1548_v7 = vmul.f32 0.5, %v1463_v44  ;;  %v1690_v51 = vld [vmem:[%s3231_s20 + $0x60] sm:$0xff] }
 0x241   : > { %v2567_v63 = vpop.eup %2566  ;;  %1843 = vst [vmem:[%s3430_s14 + $0x28] sm:$0xff] %v1827_v5  ;;  %v1736_v16 = vadd.f32 %v1720_v59, %v1704_v27  ;;  %v1577_v20 = vmul.f32 0.5, %v2565_v17  ;;  %2584 = vtanh.f32 %v1483_v4  ;;  %v1466_v50 = vadd.f32 %v3288_v23, %v3446_v62 }
 0x242   : > { %v2569_v21 = vpop.eup %2568  ;;  %v1797_v22 = vadd.f32 0.5, %v1781_v54  ;;  %2586 = vtanh.f32 %v1607_v11  ;;  %v1721_v29 = vmul.f32 %v2567_v63, %v1529_v60  ;;  %v1465_v38 = vadd.f32 %v3293_v30, %v3444_v58 }
 0x243   : > { %v2571_v6 = vpop.eup %2570  ;;  %v1752_v56 = vmul.f32 0.5, %v1736_v16  ;;  %v1593_v34 = vadd.f32 0.5, %v1577_v20  ;;  %v1514_v35 = vmul.f32 0.5, %v2569_v21  ;;  %2588 = vtanh.f32 %v1461_v33 }
 0x244   : > { %v2573_v53 = vpop.eup %2572  ;;  %2590 = vtanh.f32 %v1797_v22  ;;  %1861 = vst [vmem:[%s3380_s26 + $0x38] sm:$0xff] %v1797_v22  ;;  %v1782_v37 = vmul.f32 0.5, %v2571_v6  ;;  %v1467_v26 = vadd.f32 %v3290_v25, %v3453_v10  ;;  %v1452_v61 = vadd.f32 %v3300_v47, %v3377_v19 }
 0x245   : > { %v2575_v15 = vpop.eup %2574  ;;  %2592 = vtanh.f32 %v1752_v56  ;;  %v1705_v28 = vmul.f32 %v1689_v24, %v1593_v34  ;;  %v1530_v41 = vadd.f32 0.5, %v1514_v35  ;;  %v1637_v49 = vmul.f32 0.5, %v2573_v53  ;;  %v1691_v56 = vld [vmem:[%s3231_s20 + $0x68] sm:$0xff] }
 0x246   : > { %v2577_v12 = vpop.eup %2576  ;;  %v1798_v42 = vadd.f32 0.5, %v1782_v37  ;;  %2594 = vtanh.f32 %v1547_v32  ;;  %v1485_v62 = vmul.f32 0.5, %v1466_v50  ;;  %v1549_v10 = vmul.f32 0.5, %v1467_v26 }
 0x247   : > { %v1828_v0 = vmul.f32 %v2577_v12, %v1652_v36  ;;  %v1737_v43 = vadd.f32 %v1721_v29, %v1705_v28  ;;  %v1722_v1 = vmul.f32 %v2575_v15, %v1530_v41  ;;  %v1653_v11 = vadd.f32 0.5, %v1637_v49 }
 0x248   : > { %v2579_v3 = vpop.eup %2578  ;;  %2596 = vtanh.f32 %v1798_v42  ;;  %1862 = vst [vmem:[%s3380_s26 + $0x40] sm:$0xff] %v1798_v42  ;;  %v1609_v19 = vmul.f32 0.5, %v1452_v61  ;;  %v1469_v63 = vadd.f32 %v3293_v30, %v3455_v13  ;;  %v1456_v13 = vadd.f32 %v3300_v47, %v3401_v57 }
 0x249   : > { %v2581_v55 = vpop.eup %2580  ;;  %1844 = vst [vmem:[%s3430_s14 + $0x30] sm:$0xff] %v1828_v0  ;;  %v1753_v31 = vmul.f32 0.5, %v1737_v43  ;;  %2598 = vtanh.f32 %v1484_v46  ;;  %v1638_v27 = vmul.f32 0.5, %v2579_v3  ;;  %v1692_v3 = vld [vmem:[%s3231_s20 + $0x70] sm:$0xff] }
 0x24a   : > { %v2583_v45 = vpop.eup %2582  ;;  %v1783_v59 = vmul.f32 0.5, %v2581_v55  ;;  %2600 = vtanh.f32 %v1608_v18 }
 0x24b   : > { %v2585_v52 = vpop.eup %2584  ;;  %2602 = vtanh.f32 %v1753_v31  ;;  %v1578_v23 = vmul.f32 0.5, %v2583_v45  ;;  %v1654_v21 = vadd.f32 0.5, %v1638_v27 }
 0x24c   : > { %v2587_v39 = vpop.eup %2586  ;;  %v1799_v4 = vadd.f32 0.5, %v1783_v59  ;;  %v1515_v5 = vmul.f32 0.5, %v2585_v52  ;;  %2604 = vtanh.f32 %v1548_v7 }
 0x24d   : > { %v2589_v58 = vpop.eup %2588  ;;  %v1594_v25 = vadd.f32 0.5, %v1578_v23  ;;  %2606 = vtanh.f32 %v1465_v38  ;;  %v1639_v32 = vmul.f32 0.5, %v2587_v39  ;;  %v1460_v38 = vadd.f32 %v3300_v47, %v3414_v9 }
 0x24e   : > { %v2591_v60 = vpop.eup %2590  ;;  %2608 = vtanh.f32 %v1799_v4  ;;  %1863 = vst [vmem:[%s3380_s26 + $0x48] sm:$0xff] %v1799_v4  ;;  %v1531_v17 = vadd.f32 0.5, %v1515_v5  ;;  %v1693_v4 = vld [vmem:[%s3231_s20 + $0x78] sm:$0xff] }
 0x24f   : > { %v2593_v54 = vpop.eup %2592  ;;  %v1829_v8 = vmul.f32 %v2591_v60, %v1653_v11  ;;  %v1706_v14 = vmul.f32 %v1690_v51, %v1594_v25  ;;  %2610 = vtanh.f32 %v1485_v62  ;;  %v1655_v42 = vadd.f32 0.5, %v1639_v32 }
 0x250   : > { %v2595_v16 = vpop.eup %2594  ;;  %v1784_v20 = vmul.f32 0.5, %v2593_v54  ;;  %v1723_v33 = vmul.f32 %v2589_v58, %v1531_v17  ;;  %2612 = vtanh.f32 %v1549_v10  ;;  %v1611_v5 = vmul.f32 0.5, %v1460_v38 }
 0x251   : > { %1845 = vst [vmem:[%s3430_s14 + $0x38] sm:$0xff] %v1829_v8  ;;  %v1738_v22 = vadd.f32 %v1722_v1, %v1706_v14  ;;  %v1579_v24 = vmul.f32 0.5, %v2595_v16  ;;  %2614 = vtanh.f32 %v1609_v19  ;;  %v1610_v1 = vmul.f32 0.5, %v1456_v13 }
 0x252   : > { %v2597_v29 = vpop.eup %2596  ;;  %v1800_v6 = vadd.f32 0.5, %v1784_v20  ;;  %2616 = vtanh.f32 %v1469_v63  ;;  %v1464_v17 = vadd.f32 %v3300_v47, %v3440_v48 }
 0x253   : > { %v2599_v34 = vpop.eup %2598  ;;  %v1830_v35 = vmul.f32 %v2597_v29, %v1654_v21  ;;  %v1754_v53 = vmul.f32 0.5, %v1738_v22  ;;  %v1595_v36 = vadd.f32 0.5, %v1579_v24  ;;  %v1468_v24 = vadd.f32 %v3300_v47, %v3448_v2 }
 0x254   : > { %v2601_v30 = vpop.eup %2600  ;;  %2618 = vtanh.f32 %v1800_v6  ;;  %1864 = vst [vmem:[%s3380_s26 + $0x50] sm:$0xff] %v1800_v6  ;;  %v1516_v37 = vmul.f32 0.5, %v2599_v34  ;;  %v1612_v20 = vmul.f32 0.5, %v1464_v17 }
 0x255   : > { %v2603_v40 = vpop.eup %2602  ;;  %1846 = vst [vmem:[%s3430_s14 + $0x40] sm:$0xff] %v1830_v35  ;;  %2620 = vtanh.f32 %v1754_v53  ;;  %v1707_v15 = vmul.f32 %v1691_v56, %v1595_v36  ;;  %v1640_v50 = vmul.f32 0.5, %v2601_v30  ;;  %v1613_v56 = vmul.f32 0.5, %v1468_v24 }
 0x256   : > { %v2605_v28 = vpop.eup %2604  ;;  %v1785_v41 = vmul.f32 0.5, %v2603_v40  ;;  %v1532_v44 = vadd.f32 0.5, %v1516_v37 }
 0x257   : > { %v2607_v12 = vpop.eup %2606  ;;  %v1739_v18 = vadd.f32 %v1723_v33, %v1707_v15  ;;  %v1580_v46 = vmul.f32 0.5, %v2605_v28  ;;  %v1656_v39 = vadd.f32 0.5, %v1640_v50 }
 0x258   : > { %v2609_v0 = vpop.eup %2608  ;;  %v1801_v43 = vadd.f32 0.5, %v1785_v41  ;;  %v1724_v57 = vmul.f32 %v2607_v12, %v1532_v44 }
 0x259   : > { %v2611_v49 = vpop.eup %2610  ;;  %v1831_v7 = vmul.f32 %v2609_v0, %v1655_v42  ;;  %v1755_v55 = vmul.f32 0.5, %v1739_v18  ;;  %v1596_v31 = vadd.f32 0.5, %v1580_v46 }
 0x25a   : > { %2622 = vtanh.f32 %v1801_v43  ;;  %1865 = vst [vmem:[%s3380_s26 + $0x58] sm:$0xff] %v1801_v43  ;;  %v1517_v26 = vmul.f32 0.5, %v2611_v49  ;;  %v2613_v45 = vpop.eup %2612 }
 0x25b   : > { %1847 = vst [vmem:[%s3430_s14 + $0x48] sm:$0xff] %v1831_v7  ;;  %2624 = vtanh.f32 %v1755_v55  ;;  %v1708_v59 = vmul.f32 %v1692_v3, %v1596_v31  ;;  %v2615_v61 = vpop.eup %2614  ;;  %v1581_v23 = vmul.f32 0.5, %v2613_v45 }
 0x25c   : > { %2626 = vtanh.f32 %v1610_v1  ;;  %v1533_v52 = vadd.f32 0.5, %v1517_v26  ;;  %v2617_v62 = vpop.eup %2616  ;;  %v1641_v10 = vmul.f32 0.5, %v2615_v61 }
 0x25d   : > { %v1740_v11 = vadd.f32 %v1724_v57, %v1708_v59  ;;  %v1597_v58 = vadd.f32 0.5, %v1581_v23 }
 0x25e   : > { %v2619_v51 = vpop.eup %2618  ;;  %v1725_v27 = vmul.f32 %v2617_v62, %v1533_v52  ;;  %v1657_v63 = vadd.f32 0.5, %v1641_v10 }
 0x25f   : > { %v2621_v9 = vpop.eup %2620  ;;  %v1832_v25 = vmul.f32 %v2619_v51, %v1656_v39  ;;  %v1756_v60 = vmul.f32 0.5, %v1740_v11  ;;  %v1709_v54 = vmul.f32 %v1693_v4, %v1597_v58 }
 0x260   : > { %v1786_v19 = vmul.f32 0.5, %v2621_v9 }
 0x261   : > { %1848 = vst [vmem:[%s3430_s14 + $0x50] sm:$0xff] %v1832_v25  ;;  %2628 = vtanh.f32 %v1756_v60  ;;  %v1741_v14 = vadd.f32 %v1725_v27, %v1709_v54 }
 0x262   : > { %v1802_v8 = vadd.f32 0.5, %v1786_v19  ;;  %2630 = vtanh.f32 %v1611_v5 }
 0x263   : > { %v1757_v33 = vmul.f32 0.5, %v1741_v14 }
 0x264   : > { %v2623_v16 = vpop.eup %2622  ;;  %2632 = vtanh.f32 %v1802_v8  ;;  %1866 = vst [vmem:[%s3380_s26 + $0x60] sm:$0xff] %v1802_v8 }
 0x265   : > { %v2625_v21 = vpop.eup %2624  ;;  %v1833_v22 = vmul.f32 %v2623_v16, %v1657_v63  ;;  %2634 = vtanh.f32 %v1757_v33 }
 0x266   : > { %v2627_v48 = vpop.eup %2626  ;;  %v1787_v29 = vmul.f32 0.5, %v2625_v21  ;;  %2636 = vtanh.f32 %v1612_v20 }
 0x267   : > { %1849 = vst [vmem:[%s3430_s14 + $0x58] sm:$0xff] %v1833_v22  ;;  %v1642_v6 = vmul.f32 0.5, %v2627_v48 }
 0x268   : > { %v1803_v32 = vadd.f32 0.5, %v1787_v29 }
 0x269   : > { %v1658_v36 = vadd.f32 0.5, %v1642_v6 }
 0x26a   : > { %2638 = vtanh.f32 %v1803_v32  ;;  %1867 = vst [vmem:[%s3380_s26 + $0x68] sm:$0xff] %v1803_v32 }
 0x26b   : > { %v2629_v34 = vpop.eup %2628  ;;  %2640 = vtanh.f32 %v1613_v56 }
 0x26c   : > { %v2631_v35 = vpop.eup %2630  ;;  %v1788_v53 = vmul.f32 0.5, %v2629_v34 }
 0x26d   : > { %v1643_v13 = vmul.f32 0.5, %v2631_v35 }
 0x26e   : > { %v2633_v47 = vpop.eup %2632  ;;  %v1804_v2 = vadd.f32 0.5, %v1788_v53 }
 0x26f   : > { %v1834_v30 = vmul.f32 %v2633_v47, %v1658_v36  ;;  %v2635_v37 = vpop.eup %2634  ;;  %v1659_v28 = vadd.f32 0.5, %v1643_v13 }
 0x270   : > { %2642 = vtanh.f32 %v1804_v2  ;;  %1868 = vst [vmem:[%s3380_s26 + $0x70] sm:$0xff] %v1804_v2  ;;  %v1789_v40 = vmul.f32 0.5, %v2635_v37  ;;  %v2637_v15 = vpop.eup %2636 }
 0x271   : > { %1850 = vst [vmem:[%s3430_s14 + $0x60] sm:$0xff] %v1834_v30  ;;  %v1644_v42 = vmul.f32 0.5, %v2637_v15 }
 0x272   : > { %v1805_v41 = vadd.f32 0.5, %v1789_v40 }
 0x274   : > { %v2639_v44 = vpop.eup %2638  ;;  %2644 = vtanh.f32 %v1805_v41  ;;  %1869 = vst [vmem:[%s3380_s26 + $0x78] sm:$0xff] %v1805_v41 }
 0x275   : > { %v1835_v12 = vmul.f32 %v2639_v44, %v1659_v28 }
 0x276   : > { %2805 = shalt.err (!%p2802_p1)
}
 0x277   : > { %s2806_s8 = scalar_lea.hbm %s3543_s1, 2048  ;;  %s2810_s17 = scalar_lea.hbm %s3640_s7, 4096 }
 0x278   : > { %p2807_p5 = scmp.ne.s32.totalorder %s3543_s1, %s2806_s8  ;;  %p2811_p4 = scmp.lt.u32.totalorder %s3543_s1, %s3640_s7 }
 0x279   : > { %p2812_p8 = scmp.lt.u32.totalorder %s2810_s17, %s2806_s8  ;;  %p2814_p3 = scmp.lt.u32.totalorder %s2806_s8, %s3543_s1 }
 0x27a   : > { %p2808_p11 = pnand %p2807_p5, %p3693_p7 }
 0x27b   : > { %p2813_p13 = por %p2812_p8, %p2811_p4 }
 0x27c   : > { %p2809_p12 = pneg %p2808_p11 }
 0x27d   : > { %p2815_p0 = por %p2814_p3, %p2813_p13 }
 0x27f   : > { %p2816_p6 = pnand %p2815_p0, %p2809_p12 }
 0x281   : > { %2819 = shalt.err (!%p2816_p6)
}
 0x282   : > { %s2913_s9 = smov 128   ;;  %s2914_s26 = smov 8   ;;  %v2641_v18 = vpop.eup %2640  ;;  %1851 = vst [vmem:[%s3430_s14 + $0x68] sm:$0xff] %v1835_v12  ;;  %v1660_v46 = vadd.f32 0.5, %v1644_v42 }
 0x283   : > { %2266 = dma.vmem_to_hbm [thread:$0]  (%p3693_p7), %s3545_s19, 2048, %s3543_s1, %s1876_s22, %s2913_s9, %s2913_s9, %s2914_s26   ;;  %v2643_v0 = vpop.eup %2642  ;;  %v1645_v43 = vmul.f32 0.5, %v2641_v18 }
 0x284   : > { %v1836_v1 = vmul.f32 %v2643_v0, %v1660_v46  ;;  %s1889_s3 = sshll.u32 %s3430_s14, 4  ;;  %v2645_v57 = vpop.eup %2644  ;;  %s3583_s16 = scalar_lea.hbm %s3639_s6, %s2185_s10  ;;  %s3585_s3 = int_to_ptr.vmem [resolvable:$true] %s1889_s3 }
 0x285   : > { %v1661_v3 = vadd.f32 0.5, %v1645_v43  ;;  %s1871_s19 = scalar_lea.sflag [#allocation4], %s3210_s21  ;;  %s2820_s1 = scalar_lea.vmem %s3585_s3, 2048 }
 0x286   : > { %1852 = vst [vmem:[%s3430_s14 + $0x70] sm:$0xff] %v1836_v1  ;;  %p2821_p2 = scmp.ne.s32.totalorder %s3585_s3, %s2820_s1  ;;  %s2915_s22 = smov [#allocation11]  }
 0x287   : > { %v1837_v49 = vmul.f32 %v2645_v57, %v1661_v3  ;;  %s2824_s18 = sshll.u32 %s2915_s22, 4  ;;  %s2825_s18 = int_to_ptr.vmem [resolvable:$false] %s2824_s18 }
 0x288   : > { %p2822_p9 = pnand %p2821_p2, %p3693_p7  ;;  %s2826_s28 = scalar_lea.vmem %s2825_s18, 4096 }
 0x289   : > { %1853 = vst [vmem:[%s3430_s14 + $0x78] sm:$0xff] %v1837_v49  ;;  %p2827_p1 = scmp.lt.s32.totalorder %s3585_s3, %s2825_s18  ;;  %p2828_p5 = scmp.lt.s32.totalorder %s2826_s28, %s2820_s1 }
 0x28a   : > { %p2823_p10 = pneg %p2822_p9 }
 0x28b   : > { %p2829_p11 = por %p2828_p5, %p2827_p1 }
 0x28d   : > { %p2830_p12 = pnand %p2829_p11, %p2823_p10 }
 0x28f   : > { %2833 = shalt.err (!%p2830_p12)
}
 0x290   : > { %s2834_s14 = scalar_lea.hbm %s3583_s16, 2048  ;;  %s2838_s8 = scalar_lea.hbm %s3639_s6, 4096 }
 0x291   : > { %p2835_p4 = scmp.ne.s32.totalorder %s3583_s16, %s2834_s14  ;;  %p2839_p3 = scmp.lt.u32.totalorder %s3583_s16, %s3639_s6 }
 0x292   : > { %p2840_p0 = scmp.lt.u32.totalorder %s2838_s8, %s2834_s14  ;;  %p2842_p2 = scmp.lt.u32.totalorder %s2834_s14, %s3583_s16 }
 0x293   : > { %p2836_p8 = pnand %p2835_p4, %p3693_p7 }
 0x294   : > { %p2841_p6 = por %p2840_p0, %p2839_p3 }
 0x295   : > { %p2837_p13 = pneg %p2836_p8 }
 0x296   : > { %p2843_p9 = por %p2842_p2, %p2841_p6 }
 0x298   : > { %p2844_p10 = pnand %p2843_p9, %p2837_p13 }
 0x29a   : > { %2847 = shalt.err (!%p2844_p10)
}
 0x29b   : > { %2265 = dma.vmem_to_hbm [thread:$0]  (%p3693_p7), %s3585_s3, 2048, %s3583_s16, %s1871_s19, %s2913_s9, %s2913_s9, %s2914_s26  }
 0x29c PF: > { %s3694_s17 = sld [smem:[#allocation22_spill]]  ;;  %s1920_s20 = sand.u32 1, %s2886_s24  }
 0x29d   : > { %p3696_p5 = scmp.ge.s32.totalorder %s2898_s27, 2  ;;  %s1921_s12 = scalar_lea.sflag [#allocation4], %s1920_s20 }
 0x2a2   : > { %p3695_p1 = scmp.ne.s32.totalorder %s3694_s17, 0 }
 0x2a4   : > { %p2287_p11 = pnand %p3696_p5, %p3695_p1 }
 0x2a6   : > { %2877 = dma.done.wait (!%p2287_p11), %s1921_s12, 2048  }
 0x2a7   : > { %2879 = vsyncadd (!%p2287_p11), %s1921_s12, 4294965248  ;;  %s1930_s13 = scalar_lea.sflag [#allocation13], %s1920_s20 }
 0x2a8   : > { %2881 = dma.done.wait (!%p2287_p11), %s1930_s13, 2048  }
 0x2a9   : > { %2883 = vsyncadd (!%p2287_p11), %s1930_s13, 4294965248  ;;  %s3697_s27 = sld [smem:[#allocation20_spill]]  ;;  %s3698_s21 = sld [smem:[#allocation19_spill]] }
 0x2aa   : > { %s3699_s26 = sld [smem:[#allocation21_spill]]  ;;  %s3700_s24 = smov %s2890_s25 }
 0x2af   : > { %p28_p7 = scmp.ge.s32.totalorder %s3697_s27, 4   ;;  %s3701_s25 = smov %s3698_s21 }
 0x2b1   :  { %30 = sbr.rel (!%p28_p7) target bundleno = 13 (0xd), region = 138 }
 0x2b8   :  { %1935 = vsyncpa [#allocation3], 1 }
 0x2b9   :  { %1937 = vsyncpa [#allocation3 + $0x1], 1 }
 0x2ba   :  { %1938 = vsyncpa [#allocation6], 1 }
 0x2bb   :  { %1940 = vsyncpa [#allocation6 + $0x1], 1 }
 0x2bc   :  { %1941 = vsyncpa [#allocation9], 1 }
 0x2bd   :  { %1942 = vsyncpa [#allocation4], 1 }
 0x2be   :  { %1944 = vsyncpa [#allocation4 + $0x1], 1 }
 0x2bf   :  { %1945 = vsyncpa [#allocation13], 1 }
 0x2c0   :  { %1947 = vsyncpa [#allocation13 + $0x1], 1 }

</bundles_post_ra>
